<compile_context>
chip_gen: v6e
topology: v6e:2x2x1
jax: 0.10.0
libtpu: 0.0.40
codegen_flags: <defaults>
</compile_context>

<pallas_src>
import functools

import jax
import jax.numpy as jnp
from jax import lax
from jax.experimental import pallas as pl
from jax.experimental.pallas import tpu as pltpu


# ------------------------- Pallas attention read ---------------------------

def _mask_read_kernel(qk_ref, mk_ref, mva_ref, o_ref,
                      qk_scr, m_scr, acc_scr,
                      *, p_scalar, dv, use_bf16_exp):
    mi = pl.program_id(2)

    @pl.when(mi == 0)
    def _():
        # Hoisted once per (batch, q-tile): fold p_scalar into the tiny query
        # tile and cast to bf16 for the MXU (reused on every memory step).
        qk_scr[...] = (qk_ref[0] * p_scalar).astype(jnp.bfloat16)
        m_scr[...] = jnp.full_like(m_scr, -1e30)
        acc_scr[...] = jnp.zeros_like(acc_scr)

    mk = mk_ref[0]        # [Dk_pad, tm] bf16
    mva = mva_ref[0]      # [Dv_aug, tm] bf16  (mval rows + ones row + zero pad)

    # scores [tm, tq]: contract the channel (sublane) axis of both operands on
    # the MXU (never materializes a lane-sparse [Nm, Dk] operand).
    s = lax.dot_general(mk, qk_scr[...], (((0,), (0,)), ((), ())),
                        preferred_element_type=jnp.float32)

    # online softmax over the memory axis (rows of s)
    m_prev = m_scr[...]                                        # [1, tq]
    m_new = jnp.maximum(m_prev, jnp.max(s, axis=0, keepdims=True))
    alpha = jnp.exp(m_prev - m_new)                            # [1, tq]

    if use_bf16_exp:
        # v6e / v7x: native bf16 EUP -> exp directly in bf16, feeds the MXU.
        e = jnp.exp((s - m_new).astype(jnp.bfloat16))          # [tm, tq] bf16
    else:
        # v5e-class: no bf16 VPU/EUP -> fp32 exp, cast only for the MXU operand.
        e = jnp.exp(s - m_new).astype(jnp.bfloat16)

    # One MXU matmul yields BOTH the unnormalized read (rows :dv) and the
    # softmax denominator (the trailing ones row) -> no VPU row-sum pass.
    # Nm-padded columns carry zero mval/ones rows, so they contribute exactly
    # nothing — no explicit padding mask is ever applied.
    acc_scr[...] = alpha * acc_scr[...] + jnp.dot(
        mva, e, preferred_element_type=jnp.float32)            # [Dv_aug, tq]
    m_scr[...] = m_new

    @pl.when(mi == pl.num_programs(2) - 1)
    def _():
        denom = acc_scr[dv:dv + 1, :]        # ones-row accumulation == row sum
        o_ref[0] = (acc_scr[:dv, :] *
                    pl.reciprocal(denom, approx=True)).astype(o_ref.dtype)


def _round_up(x, m):
    return ((x + m - 1) // m) * m


def _round_down(x, m):
    return (x // m) * m


def _pick_tiles(nq, nm, batch):
    """Per-generation tile sizes, scoped VMEM limit and bf16-exp choice."""
    try:
        vmem_bytes = pltpu.get_tpu_info().vmem_capacity_bytes
    except Exception:   # interpret mode / unknown target
        vmem_bytes = 128 << 20
    try:
        kind = jax.devices()[0].device_kind.lower()
    except Exception:
        kind = ""
    # bf16 EUP/VPU only on v6e/v7x; keep softmax math fp32 on older parts.
    use_bf16_exp = not any(v in kind for v in ("v2", "v3", "v4", "v5"))

    small_vmem = vmem_bytes <= (64 << 20)   # v7x-class: 64 MiB / TensorCore
    if small_vmem:
        budget_elems = 2 * 1024 * 1024      # budget for the [tm, tq] intermediates
        tq_cap = 2048                       # bias toward larger tm (fast HBM)
        vmem_limit = 46 << 20
    else:                                   # v5e / v6e: 128 MiB VMEM
        budget_elems = 4 * 1024 * 1024
        tq_cap = 32768                      # single q-tile up to ~32K queries
        vmem_limit = 96 << 20

    nq_r = _round_up(nq, 128)
    nm_r = _round_up(nm, 128)

    # Prefer a single query tile per batch: mkey/mval then stream from HBM
    # exactly once per batch element (total traffic scales with n_q_tiles).
    tq = min(nq_r, tq_cap)
    if small_vmem and batch == 1 and tq >= nq_r and nq_r > 128:
        # v7x has two TensorCores: keep at least 2 parallel grid slices.
        tq = _round_up(max(128, nq_r // 2), 128)
    # Large memory tile within the intermediates budget -> few grid steps
    # (less ~0.35us/step pipeline overhead) and long MXU/EUP passes.
    tm = max(128, min(nm_r, _round_down(budget_elems // tq, 128)))
    return tq, tm, vmem_limit, use_bf16_exp


def mask_read(qkey, qval, mkey, mval, p_scalar=40.0):
    """Pallas implementation of SegmentationAttentionModule.maskRead with
    all-True masks (exactly what the module's forward produces)."""
    B, Dk, H, W = qkey.shape
    _, Dv, T, _, _ = mval.shape
    Nq = H * W
    Nm = T * H * W

    tq, tm, vmem_limit, use_bf16_exp = _pick_tiles(Nq, Nm, B)
    Nq_pad = _round_up(Nq, tq)
    Nm_pad = _round_up(Nm, tm)

    Dk_pad = _round_up(Dk, 8)
    Dv_aug = _round_up(Dv + 1, 8)     # mval rows + ones row, sublane aligned

    # query keys: channel-major, fp32 in HBM (p_scalar folded in-kernel)
    qk = qkey.astype(jnp.float32).reshape(B, Dk, Nq)
    qk = jnp.pad(qk, ((0, 0), (0, Dk_pad - Dk), (0, Nq_pad - Nq)))

    # memory keys: channel-major bf16 (zero on padded rows / columns)
    mk = mkey.reshape(B, Dk, Nm).astype(jnp.bfloat16)
    mk = jnp.pad(mk, ((0, 0), (0, Dk_pad - Dk), (0, Nm_pad - Nm)))

    # memory values + trailing ones row (the MXU-computed softmax denominator);
    # zero on Nm-padded columns so padding contributes nothing.
    mv = mval.reshape(B, Dv, Nm).astype(jnp.bfloat16)
    ones = jnp.ones((B, 1, Nm), jnp.bfloat16)
    mva = jnp.concatenate([mv, ones], axis=1)                       # [B, Dv+1, Nm]
    mva = jnp.pad(mva, ((0, 0), (0, Dv_aug - Dv - 1), (0, Nm_pad - Nm)))

    grid = (B, Nq_pad // tq, Nm_pad // tm)

    kernel = functools.partial(
        _mask_read_kernel, p_scalar=float(p_scalar), dv=Dv,
        use_bf16_exp=use_bf16_exp)

    n_q_tiles = Nq_pad // tq
    cost = pl.CostEstimate(
        flops=2 * B * Nm_pad * Nq_pad * (Dk_pad + Dv_aug),
        transcendentals=B * Nm_pad * Nq_pad,
        bytes_accessed=B * (4 * Dk_pad * Nq_pad + 4 * Dv * Nq_pad
                            + n_q_tiles * 2 * (Dk_pad + Dv_aug) * Nm_pad),
    )

    qread = pl.pallas_call(
        kernel,
        out_shape=jax.ShapeDtypeStruct((B, Dv, Nq_pad), jnp.float32),
        grid_spec=pltpu.PrefetchScalarGridSpec(
            num_scalar_prefetch=0,
            grid=grid,
            in_specs=[
                pl.BlockSpec((1, Dk_pad, tq), lambda b, qi, mi: (b, 0, qi)),
                pl.BlockSpec((1, Dk_pad, tm), lambda b, qi, mi: (b, 0, mi)),
                pl.BlockSpec((1, Dv_aug, tm), lambda b, qi, mi: (b, 0, mi)),
            ],
            out_specs=pl.BlockSpec((1, Dv, tq), lambda b, qi, mi: (b, 0, qi)),
            scratch_shapes=[
                pltpu.VMEM((Dk_pad, tq), jnp.bfloat16),  # scaled+cast query tile
                pltpu.VMEM((1, tq), jnp.float32),        # running max
                pltpu.VMEM((Dv_aug, tq), jnp.float32),   # read acc + denom row
            ],
        ),
        compiler_params=pltpu.CompilerParams(
            dimension_semantics=("parallel", "parallel", "arbitrary"),
            vmem_limit_bytes=vmem_limit,
        ),
        cost_estimate=cost,
    )(qk, mk, mva)

    qread = qread[:, :, :Nq].reshape(B, Dv, H, W)
    return qread.astype(qval.dtype)


# ------------------------- plain-JAX glue ----------------------------------
# TODO(synk): the injected encoder_query/encoder_memory, attention heads and
# decoder (and crit / pixel_acc for the training path) are external modules
# with unspecified architecture; deterministic 1x1-conv stand-ins are used.

def conv1x1(x, w, b):
    # x: [B, Cin, H, W], w: [Cout, Cin], b: [Cout]   (1x1 conv == channel matmul)
    return jnp.einsum("bchw,oc->bohw", x, w) + b[None, :, None, None]


def init_params(key, c_in=3, c_feat=32, dk=8, dv=16, num_classes=4):
    ks = jax.random.split(key, 8)
    s = 0.1
    return {
        "enc_q_w": jax.random.normal(ks[0], (c_feat, c_in), jnp.float32) * s,
        "enc_q_b": jnp.zeros((c_feat,), jnp.float32),
        "enc_m_w": jax.random.normal(ks[1], (c_feat, c_in), jnp.float32) * s,
        "enc_m_b": jnp.zeros((c_feat,), jnp.float32),
        "att_q_k_w": jax.random.normal(ks[2], (dk, c_feat), jnp.float32) * s,
        "att_q_k_b": jnp.zeros((dk,), jnp.float32),
        "att_q_v_w": jax.random.normal(ks[3], (dv, c_feat), jnp.float32) * s,
        "att_q_v_b": jnp.zeros((dv,), jnp.float32),
        "att_m_k_w": jax.random.normal(ks[4], (dk, c_feat), jnp.float32) * s,
        "att_m_k_b": jnp.zeros((dk,), jnp.float32),
        "att_m_v_w": jax.random.normal(ks[5], (dv, c_feat), jnp.float32) * s,
        "att_m_v_b": jnp.zeros((dv,), jnp.float32),
        "dec_w": jax.random.normal(ks[6], (num_classes, 2 * dv), jnp.float32) * s,
        "dec_b": jnp.zeros((num_classes,), jnp.float32),
    }


def segmentation_attention_forward(params, img_data, img_refs, *,
                                   normalize_key=False, p_scalar=40.0):
    """Mirrors SegmentationAttentionModule.forward with segSize given
    (inference path)."""
    # encoder_query + attention_query
    feat_q = jax.nn.relu(conv1x1(img_data, params["enc_q_w"], params["enc_q_b"]))
    qkey = conv1x1(feat_q, params["att_q_k_w"], params["att_q_k_b"])   # [B, Dk, H, W]
    qval = conv1x1(feat_q, params["att_q_v_w"], params["att_q_v_b"])   # [B, Dv, H, W]

    # memoryEncode + memoryAttention (loop over frames, stack along dim=2)
    B, C, T, H, W = img_refs.shape
    mkeys, mvals = [], []
    for t in range(T):
        feat_m = jax.nn.relu(conv1x1(img_refs[:, :, t], params["enc_m_w"], params["enc_m_b"]))
        mkeys.append(conv1x1(feat_m, params["att_m_k_w"], params["att_m_k_b"]))
        mvals.append(conv1x1(feat_m, params["att_m_v_w"], params["att_m_v_b"]))
    mkey = jnp.stack(mkeys, axis=2)   # [B, Dk, T, H, W]
    mval = jnp.stack(mvals, axis=2)   # [B, Dv, T, H, W]

    if normalize_key:
        qkey = qkey / jnp.maximum(jnp.linalg.norm(qkey, axis=1, keepdims=True), 1e-12)
        mkey = mkey / jnp.maximum(jnp.linalg.norm(mkey, axis=1, keepdims=True), 1e-12)

    # maskRead (Pallas kernel) -- masks are all-True, matching the module
    qread = mask_read(qkey, qval, mkey, mval, p_scalar=p_scalar)

    feature = jnp.concatenate([qval, qread], axis=1)                   # [B, 2*Dv, H, W]
    logits = conv1x1(feature, params["dec_w"], params["dec_b"])        # [B, ncls, H, W]
    # segSize == (H, W) here, so no bilinear resize is needed.
    pred = jax.nn.softmax(logits, axis=1)
    return pred


def _mask_read_ref(qkey, qval, mkey, mval, p_scalar):
    """Pure-JAX fp32 reference of maskRead (all-True masks)."""
    B, Dk, H, W = qkey.shape
    _, Dv, T, _, _ = mval.shape
    qk = qkey.reshape(B, Dk, -1)
    mk = mkey.reshape(B, Dk, -1)
    mv = mval.reshape(B, Dv, -1)
    s = jnp.einsum("bdm,bdq->bmq", mk, qk) * p_scalar
    p = jax.nn.softmax(s, axis=1)
    read = jnp.einsum("bvm,bmq->bvq", mv, p)
    return read.reshape(B, Dv, H, W)


if __name__ == "__main__":
    key = jax.random.PRNGKey(0)
    k_param, k_img, k_ref = jax.random.split(key, 3)

    B, C_in, T, H, W = 2, 3, 2, 16, 16
    Dk, Dv, C_feat, NCLS = 8, 16, 32, 4

    params = init_params(k_param, c_in=C_in, c_feat=C_feat, dk=Dk, dv=Dv, num_classes=NCLS)
    img_data = jax.random.normal(k_img, (B, C_in, H, W), jnp.float32)        # query image  (NCHW)
    img_refs = jax.random.normal(k_ref, (B, C_in, T, H, W), jnp.float32)     # memory frames (NCTHW)

    pred = jax.jit(segmentation_attention_forward)(params, img_data, img_refs)
    pred = jax.block_until_ready(pred)
    assert pred.shape == (B, NCLS, H, W)

    # sanity-check the Pallas maskRead against a pure-JAX fp32 reference
    feat_q = jax.nn.relu(conv1x1(img_data, params["enc_q_w"], params["enc_q_b"]))
    qkey = conv1x1(feat_q, params["att_q_k_w"], params["att_q_k_b"])
    qval = conv1x1(feat_q, params["att_q_v_w"], params["att_q_v_b"])
    mkeys, mvals = [], []
    for t in range(T):
        fm = jax.nn.relu(conv1x1(img_refs[:, :, t], params["enc_m_w"], params["enc_m_b"]))
        mkeys.append(conv1x1(fm, params["att_m_k_w"], params["att_m_k_b"]))
        mvals.append(conv1x1(fm, params["att_m_v_w"], params["att_m_v_b"]))
    mkey = jnp.stack(mkeys, axis=2)
    mval = jnp.stack(mvals, axis=2)

    qread_pallas = jax.block_until_ready(mask_read(qkey, qval, mkey, mval, p_scalar=40.0))
    qread_ref = _mask_read_ref(qkey, qval, mkey, mval, p_scalar=40.0)
    # bf16 MXU inputs / bf16 exp + approx reciprocal -> loosened tolerance vs fp32 reference
    max_err = float(jnp.max(jnp.abs(qread_pallas - qread_ref)))
    assert jnp.allclose(qread_pallas, qread_ref, atol=2e-2, rtol=2e-2), max_err

    print("KERNEL_OK")
</pallas_src>

<mosaic_0001>
module attributes {stable_mosaic.version = 11 : i64} {
  func.func @_mask_read_kernel(%arg0: i32, %arg1: i32, %arg2: i32, %arg3: memref<1x8x256xf32, #tpu.memory_space<vmem>>, %arg4: memref<1x8x512xbf16, #tpu.memory_space<vmem>>, %arg5: memref<1x24x512xbf16, #tpu.memory_space<vmem>>, %arg6: memref<1x16x256xf32, #tpu.memory_space<vmem>>, %arg7: memref<8x256xbf16, #tpu.memory_space<vmem>>, %arg8: memref<1x256xf32, #tpu.memory_space<vmem>>, %arg9: memref<24x256xf32, #tpu.memory_space<vmem>>) attributes {dimension_semantics = [#tpu.dimension_semantics<parallel>, #tpu.dimension_semantics<parallel>, #tpu.dimension_semantics<arbitrary>], iteration_bounds = array<i64: 2, 1, 1>, scalar_prefetch = 0 : i64, scratch_operands = 3 : i64, tpu.core_type = #tpu.core_type<tc>, window_params = [{transform_indices = @transform_0, window_bounds = array<i64: 1, 8, 256>}, {transform_indices = @transform_1, window_bounds = array<i64: 1, 8, 512>}, {transform_indices = @transform_2, window_bounds = array<i64: 1, 24, 512>}, {transform_indices = @transform_3, window_bounds = array<i64: 1, 16, 256>}]} {
    %c0_i32 = arith.constant 0 : i32
    %0 = arith.cmpi eq, %arg2, %c0_i32 : i32
    %1 = arith.extui %0 : i1 to i32
    %c0_i32_0 = arith.constant 0 : i32
    %2 = arith.cmpi ne, %1, %c0_i32_0 : i32
    scf.if %2 {
      %c0_20 = arith.constant 0 : index
      %c0_21 = arith.constant 0 : index
      %c0_22 = arith.constant 0 : index
      %29 = vector.load %arg3[%c0_20, %c0_21, %c0_22] : memref<1x8x256xf32, #tpu.memory_space<vmem>>, vector<1x8x256xf32>
      %30 = vector.shape_cast %29 : vector<1x8x256xf32> to vector<8x256xf32>
      %cst_23 = arith.constant 4.000000e+01 : f32
      %31 = vector.broadcast %cst_23 : f32 to vector<8x256xf32>
      %32 = arith.mulf %30, %31 : vector<8x256xf32>
      %33 = arith.truncf %32 : vector<8x256xf32> to vector<8x256xbf16>
      %c0_24 = arith.constant 0 : index
      %c0_25 = arith.constant 0 : index
      %34 = vector.load %arg7[%c0_24, %c0_25] : memref<8x256xbf16, #tpu.memory_space<vmem>>, vector<8x256xbf16>
      tpu.vector_store %arg7[%c0_24, %c0_25], %33 {strides = array<i32>} : memref<8x256xbf16, #tpu.memory_space<vmem>>, vector<8x256xbf16>,
      %cst_26 = arith.constant -1.000000e+30 : f32
      %35 = vector.broadcast %cst_26 : f32 to vector<1x256xf32>
      %c0_27 = arith.constant 0 : index
      %c0_28 = arith.constant 0 : index
      %36 = vector.load %arg8[%c0_27, %c0_28] : memref<1x256xf32, #tpu.memory_space<vmem>>, vector<1x256xf32>
      tpu.vector_store %arg8[%c0_27, %c0_28], %35 {strides = array<i32>} : memref<1x256xf32, #tpu.memory_space<vmem>>, vector<1x256xf32>,
      %cst_29 = arith.constant 0.000000e+00 : f32
      %37 = vector.broadcast %cst_29 : f32 to vector<24x256xf32>
      %c0_30 = arith.constant 0 : index
      %c0_31 = arith.constant 0 : index
      %38 = vector.load %arg9[%c0_30, %c0_31] : memref<24x256xf32, #tpu.memory_space<vmem>>, vector<24x256xf32>
      tpu.vector_store %arg9[%c0_30, %c0_31], %37 {strides = array<i32>} : memref<24x256xf32, #tpu.memory_space<vmem>>, vector<24x256xf32>,
    } else {
    }
    %c0 = arith.constant 0 : index
    %c0_1 = arith.constant 0 : index
    %c0_2 = arith.constant 0 : index
    %3 = vector.load %arg4[%c0, %c0_1, %c0_2] : memref<1x8x512xbf16, #tpu.memory_space<vmem>>, vector<1x8x512xbf16>
    %4 = vector.shape_cast %3 : vector<1x8x512xbf16> to vector<8x512xbf16>
    %c0_3 = arith.constant 0 : index
    %c0_4 = arith.constant 0 : index
    %c0_5 = arith.constant 0 : index
    %5 = vector.load %arg5[%c0_3, %c0_4, %c0_5] : memref<1x24x512xbf16, #tpu.memory_space<vmem>>, vector<1x24x512xbf16>
    %6 = vector.shape_cast %5 : vector<1x24x512xbf16> to vector<24x512xbf16>
    %c0_6 = arith.constant 0 : index
    %c0_7 = arith.constant 0 : index
    %7 = vector.load %arg7[%c0_6, %c0_7] : memref<8x256xbf16, #tpu.memory_space<vmem>>, vector<8x256xbf16>
    %cst = arith.constant dense<0.000000e+00> : vector<512x256xf32>
    %8 = tpu.matmul %4, %7, %cst {dimension_numbers = #tpu.dot_dimension_numbers<[0], [0], [1], [1], [0, 1, 1, 1], [], []>} : vector<8x512xbf16>, vector<8x256xbf16>, vector<512x256xf32> -> vector<512x256xf32>
    %c0_8 = arith.constant 0 : index
    %c0_9 = arith.constant 0 : index
    %9 = vector.load %arg8[%c0_8, %c0_9] : memref<1x256xf32, #tpu.memory_space<vmem>>, vector<1x256xf32>
    %cst_10 = arith.constant dense<0xFF800000> : vector<256xf32>
    %10 = vector.multi_reduction <maximumf>, %8, %cst_10 [0] : vector<512x256xf32> to vector<256xf32>
    %11 = vector.shape_cast %10 : vector<256xf32> to vector<1x256xf32>
    %12 = arith.maximumf %9, %11 : vector<1x256xf32>
    %13 = arith.subf %9, %12 : vector<1x256xf32>
    %14 = math.exp %13 : vector<1x256xf32>
    %15 = vector.broadcast %12 : vector<1x256xf32> to vector<512x256xf32>
    %16 = arith.subf %8, %15 : vector<512x256xf32>
    %17 = arith.truncf %16 : vector<512x256xf32> to vector<512x256xbf16>
    %18 = math.exp %17 : vector<512x256xbf16>
    %c0_11 = arith.constant 0 : index
    %c0_12 = arith.constant 0 : index
    %19 = vector.load %arg9[%c0_11, %c0_12] : memref<24x256xf32, #tpu.memory_space<vmem>>, vector<24x256xf32>
    %20 = vector.broadcast %14 : vector<1x256xf32> to vector<24x256xf32>
    %21 = arith.mulf %20, %19 : vector<24x256xf32>
    %cst_13 = arith.constant dense<0.000000e+00> : vector<24x256xf32>
    %22 = tpu.matmul %6, %18, %cst_13 {dimension_numbers = #tpu.dot_dimension_numbers<[1], [0], [0], [1], [0, 0, 1, 1], [], []>} : vector<24x512xbf16>, vector<512x256xbf16>, vector<24x256xf32> -> vector<24x256xf32>
    %23 = arith.addf %21, %22 : vector<24x256xf32>
    %c0_14 = arith.constant 0 : index
    %c0_15 = arith.constant 0 : index
    %24 = vector.load %arg9[%c0_14, %c0_15] : memref<24x256xf32, #tpu.memory_space<vmem>>, vector<24x256xf32>
    tpu.vector_store %arg9[%c0_14, %c0_15], %23 {strides = array<i32>} : memref<24x256xf32, #tpu.memory_space<vmem>>, vector<24x256xf32>,
    %c0_16 = arith.constant 0 : index
    %c0_17 = arith.constant 0 : index
    %25 = vector.load %arg8[%c0_16, %c0_17] : memref<1x256xf32, #tpu.memory_space<vmem>>, vector<1x256xf32>
    tpu.vector_store %arg8[%c0_16, %c0_17], %12 {strides = array<i32>} : memref<1x256xf32, #tpu.memory_space<vmem>>, vector<1x256xf32>,
    %c0_i32_18 = arith.constant 0 : i32
    %26 = arith.cmpi eq, %arg2, %c0_i32_18 : i32
    %27 = arith.extui %26 : i1 to i32
    %c0_i32_19 = arith.constant 0 : i32
    %28 = arith.cmpi ne, %27, %c0_i32_19 : i32
    scf.if %28 {
      %c16 = arith.constant 16 : index
      %c0_20 = arith.constant 0 : index
      %29 = vector.load %arg9[%c16, %c0_20] : memref<24x256xf32, #tpu.memory_space<vmem>>, vector<1x256xf32>
      %c0_21 = arith.constant 0 : index
      %c0_22 = arith.constant 0 : index
      %30 = vector.load %arg9[%c0_21, %c0_22] : memref<24x256xf32, #tpu.memory_space<vmem>>, vector<16x256xf32>
      %31 = tpu.reciprocal %29 {approx = true} : vector<1x256xf32> -> vector<1x256xf32>
      %32 = vector.broadcast %31 : vector<1x256xf32> to vector<16x256xf32>
      %33 = arith.mulf %30, %32 : vector<16x256xf32>
      %c0_23 = arith.constant 0 : index
      %c0_24 = arith.constant 0 : index
      %c0_25 = arith.constant 0 : index
      %34 = vector.load %arg6[%c0_23, %c0_24, %c0_25] : memref<1x16x256xf32, #tpu.memory_space<vmem>>, vector<1x16x256xf32>
      %35 = vector.shape_cast %34 : vector<1x16x256xf32> to vector<16x256xf32>
      %36 = vector.shape_cast %33 : vector<16x256xf32> to vector<1x16x256xf32>
      tpu.vector_store %arg6[%c0_23, %c0_24, %c0_25], %36 {strides = array<i32>} : memref<1x16x256xf32, #tpu.memory_space<vmem>>, vector<1x16x256xf32>,
    } else {
    }
    return
  }
  func.func @transform_0(%arg0: i32, %arg1: i32, %arg2: i32) -> (i32, i32, i32) {
    %c0_i32 = arith.constant 0 : i32
    %c0_i32_0 = arith.constant 0 : i32
    return %arg0, %c0_i32, %arg1 : i32, i32, i32
  }
  func.func @transform_1(%arg0: i32, %arg1: i32, %arg2: i32) -> (i32, i32, i32) {
    %c0_i32 = arith.constant 0 : i32
    %c0_i32_0 = arith.constant 0 : i32
    return %arg0, %c0_i32, %arg2 : i32, i32, i32
  }
  func.func @transform_2(%arg0: i32, %arg1: i32, %arg2: i32) -> (i32, i32, i32) {
    %c0_i32 = arith.constant 0 : i32
    %c0_i32_0 = arith.constant 0 : i32
    return %arg0, %c0_i32, %arg2 : i32, i32, i32
  }
  func.func @transform_3(%arg0: i32, %arg1: i32, %arg2: i32) -> (i32, i32, i32) {
    %c0_i32 = arith.constant 0 : i32
    %c0_i32_0 = arith.constant 0 : i32
    return %arg0, %c0_i32, %arg1 : i32, i32, i32
  }
}

</mosaic_0001>

<bundles_post_ra>
// kernel: segmentation_attention_forward.1
= control target key start
LH: loop header
LB: loop body
LE: loop exit
PB: predicated region body
PF: predicated region fallthrough
CT: control target
= control target key end

     0   :  { %s2046_s12 = smov 0   ;;  %s2048_s13 = smov 0   ;;  %s2852_s0 = inlined_call_operand.vmem [shape: f32[2,8,256], index: 0, kind: input, shape index: {}]   ;;  %s2853_s1 = inlined_call_operand.vmem [shape: bf16[2,8,512], index: 1, kind: input, shape index: {}]   ;;  %s2854_s2 = inlined_call_operand.vmem [shape: bf16[2,24,512], index: 2, kind: input, shape index: {}]   ;;  %s2855_s3 = inlined_call_operand.vmem [shape: f32[2,16,256], index: 3, kind: output, shape index: {}]  }
   0x1   :  { %s2050_s14 = smov 0  }
   0x2 LB: > { %s32_s15 = sadd.s32 1, %s2017_s13  ;;  %p1758_p0 = scmp.ge.s32.totalorder %s2021_s14, 1  ;;  %s2021_s14 = sphi %s2050_s14, %s13_s14   ;;  %s2017_s13 = sphi %s2048_s13, %s3155_s13   ;;  %s2013_s12 = sphi %s2046_s12, %s3154_s12  }
   0x3   : > { %p34_p1 = scmp.ge.s32.totalorder %s32_s15, 2  ;;  %p199_p2 = scmp.lt.s32.totalorder %s2021_s14, 3 }
   0x5   : > { %s3157_s15 = smov (%p34_p1, %s32_s15), 0  ;;  %p200_p3 = pnand %p1758_p0, %p199_p2 }
   0x7   : > { %203 = sbr.rel (%p200_p3) target bundleno = 900 (0x384), region = 32 }
   0xc   : > { %p250_p4 = scmp.lt.s32.totalorder %s2013_s12, 1  ;;  %v2023_v0 = vmov 0   ;;  %vm507_vm0 = vcmask 1043456   ;;  %vm410_vm1 = vcmask 64512  }
   0xd   : > { %546 = vmatprep.mubr.bf16.mxu0 %v2023_v0  ;;  %756 = vmatprep.mubr.bf16.mxu1 %v2023_v0 }
   0xe   : > { %s3159_s12 = smov (!%p250_p4, %s2013_s12), 1 }
   0xf   : > { %s1816_s16 = sshll.u32 %s3159_s12, 4  ;;  %s1824_s17 = smul.u32 48, %s3159_s12 }
  0x10   : > { %s267_s20 = scalar_lea.vmem %s2853_s1, %s1816_s16  ;;  %s257_s26 = scalar_lea.vmem %s2852_s0, %s1816_s16 }
  0x11   : > { %s2076_s23 = scalar_lea.vmem %s2854_s2, %s1824_s17  ;;  %v318_v1 = vld [vmem:[%s267_s20] sm:$0xff]  ;;  %v319_v2 = vld [vmem:[%s267_s20 + $0x8] sm:$0xff]  ;;  %s1818_s27 = sshll.u32 %s3159_s12, 5 }
  0x12   : > { %v1767_v3 = vcombine.low %v318_v1, %v318_v1  ;;  %v1769_v4 = vcombine.low %v319_v2, %v319_v2  ;;  %v295_v5 = vld [vmem:[%s257_s26 + $0x8] sm:$0xff]  ;;  %v294_v6 = vld [vmem:[%s257_s26] sm:$0xff]  ;;  %v1768_v12 = vcombine.high %v318_v1, %v318_v1  ;;  %v1770_v13 = vcombine.high %v319_v2, %v319_v2  ;;  %s287_s30 = scalar_lea.vmem %s2855_s3, %s1818_s27 }
  0x13   : > { %v297_v7 = vmul.f32 40.0, %v295_v5  ;;  %v296_v8 = vmul.f32 40.0, %v294_v6 }
  0x14   : > { %341 = vxpose.xlu0.c.b16.start.end [1/1] (short) %v1767_v3, 128  ;;  %373 = vxpose.xlu1.c.b16.start.end [1/1] (short) %v1769_v4, 128 }
  0x15   : > { %v1821_v9 = vpack.c.bf16 %v297_v7, %v297_v7  ;;  %v1820_v10 = vpack.c.bf16 %v296_v8, %v296_v8 }
  0x17   : > { %1773 = vmatprep.subr.msk.bf16.mxu0 %vm507_vm0, %v1821_v9  ;;  %v509_v11 = vsel %vm507_vm0, %v1820_v10, 0  ;;  %1822 = vmatprep.subr.msk.bf16.mxu1 %vm507_vm0, %v1821_v9 }
  0x18   : > { %529 = vmatpush1.bf16.msra.mxu0 %v509_v11  ;;  %1823 = vmatpush1.bf16.msra.mxu1 %v509_v11 }
  0x31   : > { %357 = vxpose.xlu0.c.b16.start.end [1/1] (short) %v1768_v12, 128  ;;  %389 = vxpose.xlu1.c.b16.start.end [1/1] (short) %v1770_v13, 128 }
  0x76   : > { %v349_v14 = vpop.trf.xlu0  ;;  %v2081_v15 = vpop.trf.xlu1 }
  0x77   : > { %1774 = vmatmul.mubr.msk.bf16.vlgmr.msra.gmra.mxu0 %vm410_vm1, %v349_v14 }
  0x78   : > { %556 = vmatprep.mubr.bf16.mxu0 %v2023_v0 }
  0x7a   : > { %v2085_v16 = vpop.trf.xlu1  ;;  %v350_v17 = vpop.trf.xlu0 }
  0x7e   : > { %v2087_v18 = vpop.trf.xlu1  ;;  %v351_v20 = vpop.trf.xlu0 }
  0x7f   : > { %1775 = vmatmul.mubr.msk.bf16.gmra.mxu0 %vm410_vm1, %v350_v17 }
  0x80   : > { %566 = vmatprep.mubr.bf16.mxu0 %v2023_v0 }
  0x82   : > { %v2091_v19 = vpop.trf.xlu1  ;;  %v352_v23 = vpop.trf.xlu0 }
  0x86   : > { %v2093_v21 = vpop.trf.xlu1  ;;  %v353_v25 = vpop.trf.xlu0 }
  0x87   : > { %1776 = vmatmul.mubr.msk.bf16.gmra.mxu0 %vm410_vm1, %v351_v20 }
  0x88   : > { %576 = vmatprep.mubr.bf16.mxu0 %v2023_v0 }
  0x8a   : > { %v386_v22 = vpop.trf.xlu1  ;;  %v354_v27 = vpop.trf.xlu0 }
  0x8b   : > { %1795 = vmatmul.mubr.msk.bf16.vlgmr.msra.gmra.mxu1 %vm410_vm1, %v386_v22 }
  0x8c   : > { %766 = vmatprep.mubr.bf16.mxu1 %v2023_v0 }
  0x8e   : > { %v387_v24 = vpop.trf.xlu1  ;;  %v355_v29 = vpop.trf.xlu0 }
  0x8f   : > { %1777 = vmatmul.mubr.msk.bf16.gmra.mxu0 %vm410_vm1, %v352_v23 }
  0x90   : > { %586 = vmatprep.mubr.bf16.mxu0 %v2023_v0 }
  0x92   : > { %v388_v26 = vpop.trf.xlu1  ;;  %v356_v31 = vpop.trf.xlu0 }
  0x93   : > { %1796 = vmatmul.mubr.msk.bf16.gmra.mxu1 %vm410_vm1, %v387_v24 }
  0x94   : > { %776 = vmatprep.mubr.bf16.mxu1 %v2023_v0 }
  0x96   : > { %v397_v28 = vpop.trf.xlu1  ;;  %v365_v33 = vpop.trf.xlu0 }
  0x97   : > { %1778 = vmatmul.mubr.msk.bf16.gmra.mxu0 %vm410_vm1, %v353_v25 }
  0x98   : > { %596 = vmatprep.mubr.bf16.mxu0 %v2023_v0 }
  0x9a   : > { %v398_v30 = vpop.trf.xlu1  ;;  %v366_v35 = vpop.trf.xlu0 }
  0x9b   : > { %1797 = vmatmul.mubr.msk.bf16.gmra.mxu1 %vm410_vm1, %v388_v26 }
  0x9c   : > { %786 = vmatprep.mubr.bf16.mxu1 %v2023_v0 }
  0x9e   : > { %v399_v32 = vpop.trf.xlu1  ;;  %v367_v37 = vpop.trf.xlu0 }
  0x9f   : > { %1779 = vmatmul.mubr.msk.bf16.gmra.mxu0 %vm410_vm1, %v354_v27  ;;  %v2856_v27 = vlaneseq }
  0xa0   : > { %606 = vmatprep.mubr.bf16.mxu0 %v2023_v0 }
  0xa1   : > { %vm2251_vm2 = vcmp.lt.s32.totalorder %v2856_v27, 256 }
  0xa2   : > { %v400_v34 = vpop.trf.xlu1  ;;  %v368_v39 = vpop.trf.xlu0 }
  0xa3   : > { %1798 = vmatmul.mubr.msk.bf16.gmra.mxu1 %vm410_vm1, %v397_v28 }
  0xa4   : > { %796 = vmatprep.mubr.bf16.mxu1 %v2023_v0 }
  0xa6   : > { %v401_v36 = vpop.trf.xlu1  ;;  %v369_v41 = vpop.trf.xlu0 }
  0xa7   : > { %1780 = vmatmul.mubr.msk.bf16.gmra.mxu0 %vm410_vm1, %v355_v29  ;;  %v2982_v29 = vmov 0 }
  0xa8   : > { %616 = vmatprep.mubr.bf16.mxu0 %v2023_v0  ;;  %v2983_v29 = vsel %vm2251_vm2, 4294967295, %v2982_v29 }
  0xa9   : > { %2984 = vst [vmem:[#allocation40_spill] sm:$0xff] %v2983_v29 }
  0xaa   : > { %v402_v38 = vpop.trf.xlu1  ;;  %v370_v43 = vpop.trf.xlu0 }
  0xab   : > { %1799 = vmatmul.mubr.msk.bf16.gmra.mxu1 %vm410_vm1, %v398_v30  ;;  %v2024_v30 = vmov -1e+30  }
  0xac   : > { %806 = vmatprep.mubr.bf16.mxu1 %v2023_v0  ;;  %311 = vst.msk [vmem:[#allocation3] sm:$0x3] %vm2251_vm2, %v2024_v30 }
  0xae   : > { %v403_v40 = vpop.trf.xlu1  ;;  %v371_v44 = vpop.trf.xlu0 }
  0xaf   : > { %1781 = vmatmul.mubr.msk.bf16.gmra.mxu0 %vm410_vm1, %v356_v31 }
  0xb0   : > { %626 = vmatprep.mubr.bf16.mxu0 %v2023_v0 }
  0xb2   : > { %v404_v42 = vpop.trf.xlu1  ;;  %v372_v45 = vpop.trf.xlu0 }
  0xb3   : > { %1800 = vmatmul.mubr.msk.bf16.gmra.mxu1 %vm410_vm1, %v399_v32 }
  0xb4   : > { %816 = vmatprep.mubr.bf16.mxu1 %v2023_v0 }
  0xb7   : > { %1782 = vmatmul.mubr.msk.bf16.gmra.mxu0 %vm410_vm1, %v365_v33 }
  0xb8   : > { %636 = vmatprep.mubr.bf16.mxu0 %v2023_v0 }
  0xbb   : > { %1801 = vmatmul.mubr.msk.bf16.gmra.mxu1 %vm410_vm1, %v400_v34 }
  0xbc   : > { %826 = vmatprep.mubr.bf16.mxu1 %v2023_v0 }
  0xbf   : > { %1783 = vmatmul.mubr.msk.bf16.gmra.mxu0 %vm410_vm1, %v366_v35 }
  0xc0   : > { %646 = vmatprep.mubr.bf16.mxu0 %v2023_v0 }
  0xc3   : > { %1802 = vmatmul.mubr.msk.bf16.gmra.mxu1 %vm410_vm1, %v401_v36 }
  0xc4   : > { %836 = vmatprep.mubr.bf16.mxu1 %v2023_v0 }
  0xc7   : > { %1784 = vmatmul.mubr.msk.bf16.gmra.mxu0 %vm410_vm1, %v367_v37 }
  0xc8   : > { %656 = vmatprep.mubr.bf16.mxu0 %v2023_v0 }
  0xcb   : > { %1803 = vmatmul.mubr.msk.bf16.gmra.mxu1 %vm410_vm1, %v402_v38 }
  0xcc   : > { %846 = vmatprep.mubr.bf16.mxu1 %v2023_v0 }
  0xcf   : > { %1785 = vmatmul.mubr.msk.bf16.gmra.mxu0 %vm410_vm1, %v368_v39 }
  0xd0   : > { %666 = vmatprep.mubr.bf16.mxu0 %v2023_v0 }
  0xd3   : > { %1804 = vmatmul.mubr.msk.bf16.gmra.mxu1 %vm410_vm1, %v403_v40 }
  0xd4   : > { %856 = vmatprep.mubr.bf16.mxu1 %v2023_v0 }
  0xd7   : > { %1786 = vmatmul.mubr.msk.bf16.gmra.mxu0 %vm410_vm1, %v369_v41 }
  0xd8   : > { %676 = vmatprep.mubr.bf16.mxu0 %v2023_v0 }
  0xdb   : > { %1805 = vmatmul.mubr.msk.bf16.gmra.mxu1 %vm410_vm1, %v404_v42 }
  0xdf   : > { %1787 = vmatmul.mubr.msk.bf16.gmra.mxu0 %vm410_vm1, %v370_v43 }
  0xe0   : > { %686 = vmatprep.mubr.bf16.mxu0 %v2023_v0 }
  0xe7   : > { %1788 = vmatmul.mubr.msk.bf16.gmra.mxu0 %vm410_vm1, %v371_v44 }
  0xe8   : > { %696 = vmatprep.mubr.bf16.mxu0 %v2023_v0 }
  0xef   : > { %1789 = vmatmul.mubr.msk.bf16.gmra.mxu0 %vm410_vm1, %v372_v45 }
  0xf0   : > { %706 = vmatprep.mubr.bf16.mxu0 %v2023_v0 }
  0xf7   : > { %1790 = vmatmul.mubr.msk.bf16.gmra.mxu0 %vm410_vm1, %v2081_v15 }
  0xf8   : > { %716 = vmatprep.mubr.bf16.mxu0 %v2023_v0 }
  0xff   : > { %1791 = vmatmul.mubr.msk.bf16.gmra.mxu0 %vm410_vm1, %v2085_v16 }
 0x100   : > { %726 = vmatprep.mubr.bf16.mxu0 %v2023_v0 }
 0x107   : > { %1792 = vmatmul.mubr.msk.bf16.gmra.mxu0 %vm410_vm1, %v2087_v18 }
 0x108   : > { %736 = vmatprep.mubr.bf16.mxu0 %v2023_v0 }
 0x10f   : > { %1793 = vmatmul.mubr.msk.bf16.gmra.mxu0 %vm410_vm1, %v2091_v19 }
 0x110   : > { %746 = vmatprep.mubr.bf16.mxu0 %v2023_v0 }
 0x117   : > { %1794 = vmatmul.mubr.msk.bf16.gmra.mxu0 %vm410_vm1, %v2093_v21 }
 0x137   : > { %v2158_v46 = vpop.f32.mrf.mxu0 }
 0x138   : > { %2947 = vst [vmem:[#allocation5_spill] sm:$0xff] %v2158_v46 }
 0x139   : > { %v2160_v47 = vpop.f32.mrf.mxu0 }
 0x13a   : > { %2948 = vst [vmem:[#allocation6_spill] sm:$0xff] %v2160_v47 }
 0x13b   : > { %v2162_v48 = vpop.f32.mrf.mxu0 }
 0x13c   : > { %2949 = vst [vmem:[#allocation7_spill] sm:$0xff] %v2162_v48 }
 0x13d   : > { %v2164_v49 = vpop.f32.mrf.mxu0 }
 0x13e   : > { %2950 = vst [vmem:[#allocation8_spill] sm:$0xff] %v2164_v49 }
 0x13f   : > { %v2166_v50 = vpop.f32.mrf.mxu0 }
 0x140   : > { %2951 = vst [vmem:[#allocation9_spill] sm:$0xff] %v2166_v50 }
 0x141   : > { %v2168_v51 = vpop.f32.mrf.mxu0 }
 0x142   : > { %2952 = vst [vmem:[#allocation10_spill] sm:$0xff] %v2168_v51 }
 0x143   : > { %v2170_v52 = vpop.f32.mrf.mxu0 }
 0x144   : > { %2953 = vst [vmem:[#allocation11_spill] sm:$0xff] %v2170_v52 }
 0x145   : > { %v2172_v53 = vpop.f32.mrf.mxu0 }
 0x146   : > { %2954 = vst [vmem:[#allocation12_spill] sm:$0xff] %v2172_v53 }
 0x147   : > { %v2174_v54 = vpop.f32.mrf.mxu0 }
 0x148   : > { %2955 = vst [vmem:[#allocation13_spill] sm:$0xff] %v2174_v54 }
 0x149   : > { %v2176_v55 = vpop.f32.mrf.mxu0 }
 0x14a   : > { %2956 = vst [vmem:[#allocation14_spill] sm:$0xff] %v2176_v55 }
 0x14b   : > { %v2178_v56 = vpop.f32.mrf.mxu0  ;;  %v2180_v57 = vpop.f32.mrf.mxu1 }
 0x14c   : > { %2957 = vst [vmem:[#allocation15_spill] sm:$0xff] %v2178_v56  ;;  %2958 = vst [vmem:[#allocation16_spill] sm:$0xff] %v2180_v57 }
 0x14d   : > { %v2182_v58 = vpop.f32.mrf.mxu0  ;;  %v2184_v59 = vpop.f32.mrf.mxu1 }
 0x14e   : > { %2959 = vst [vmem:[#allocation17_spill] sm:$0xff] %v2182_v58  ;;  %2960 = vst [vmem:[#allocation18_spill] sm:$0xff] %v2184_v59 }
 0x14f   : > { %v2186_v60 = vpop.f32.mrf.mxu0  ;;  %v2188_v61 = vpop.f32.mrf.mxu1 }
 0x150   : > { %2961 = vst [vmem:[#allocation19_spill] sm:$0xff] %v2186_v60  ;;  %2962 = vst [vmem:[#allocation20_spill] sm:$0xff] %v2188_v61 }
 0x151   : > { %v2190_v62 = vpop.f32.mrf.mxu0  ;;  %v2192_v63 = vpop.f32.mrf.mxu1 }
 0x152   : > { %2963 = vst [vmem:[#allocation21_spill] sm:$0xff] %v2190_v62  ;;  %2964 = vst [vmem:[#allocation22_spill] sm:$0xff] %v2192_v63 }
 0x153   : > { %v2194_v0 = vpop.f32.mrf.mxu0  ;;  %v2196_v1 = vpop.f32.mrf.mxu1 }
 0x154   : > { %2965 = vst [vmem:[#allocation23_spill] sm:$0xff] %v2194_v0  ;;  %2966 = vst [vmem:[#allocation24_spill] sm:$0xff] %v2196_v1 }
 0x155   : > { %v2198_v2 = vpop.f32.mrf.mxu0  ;;  %v2200_v3 = vpop.f32.mrf.mxu1 }
 0x156   : > { %2967 = vst [vmem:[#allocation25_spill] sm:$0xff] %v2198_v2  ;;  %2968 = vst [vmem:[#allocation26_spill] sm:$0xff] %v2200_v3 }
 0x157   : > { %v2202_v4 = vpop.f32.mrf.mxu0  ;;  %v2204_v5 = vpop.f32.mrf.mxu1 }
 0x158   : > { %2969 = vst [vmem:[#allocation27_spill] sm:$0xff] %v2202_v4  ;;  %2970 = vst [vmem:[#allocation28_spill] sm:$0xff] %v2204_v5 }
 0x159   : > { %v2206_v6 = vpop.f32.mrf.mxu0  ;;  %v2210_v8 = vpop.f32.mrf.mxu1 }
 0x15a   : > { %2971 = vst [vmem:[#allocation29_spill] sm:$0xff] %v2206_v6  ;;  %2973 = vst [vmem:[#allocation31_spill] sm:$0xff] %v2210_v8 }
 0x15b   : > { %v2208_v7 = vpop.f32.mrf.mxu0  ;;  %v2216_v11 = vpop.f32.mrf.mxu1 }
 0x15c   : > { %2972 = vst [vmem:[#allocation30_spill] sm:$0xff] %v2208_v7  ;;  %2975 = vst [vmem:[#allocation33_spill] sm:$0xff] %v2216_v11 }
 0x15d   : > { %v2212_v9 = vpop.f32.mrf.mxu0  ;;  %v2222_v14 = vpop.f32.mrf.mxu1 }
 0x15e   : > { %2974 = vst [vmem:[#allocation32_spill] sm:$0xff] %v2212_v9  ;;  %2976 = vst [vmem:[#allocation34_spill] sm:$0xff] %v2222_v14 }
 0x15f   : > { %v2214_v10 = vpop.f32.mrf.mxu0  ;;  %v2228_v17 = vpop.f32.mrf.mxu1 }
 0x160   : > { %2977 = vst [vmem:[#allocation35_spill] sm:$0xff] %v2228_v17 }
 0x161   : > { %v2218_v12 = vpop.f32.mrf.mxu0  ;;  %v2234_v20 = vpop.f32.mrf.mxu1 }
 0x162   : > { %2978 = vst [vmem:[#allocation36_spill] sm:$0xff] %v2234_v20 }
 0x163   : > { %v2220_v13 = vpop.f32.mrf.mxu0  ;;  %v2240_v23 = vpop.f32.mrf.mxu1 }
 0x164   : > { %2979 = vst [vmem:[#allocation37_spill] sm:$0xff] %v2240_v23 }
 0x165   : > { %v2224_v15 = vpop.f32.mrf.mxu0  ;;  %v2246_v26 = vpop.f32.mrf.mxu1 }
 0x166   : > { %2980 = vst [vmem:[#allocation38_spill] sm:$0xff] %v2246_v26 }
 0x167   : > { %v2226_v16 = vpop.f32.mrf.mxu0  ;;  %v2259_v32 = vpop.f32.mrf.mxu1 }
 0x168   : > { %2986 = vst [vmem:[#allocation42_spill] sm:$0xff] %v2259_v32 }
 0x169   : > { %v2230_v18 = vpop.f32.mrf.mxu0  ;;  %v2265_v35 = vpop.f32.mrf.mxu1 }
 0x16a   : > { %2989 = vst [vmem:[#allocation45_spill] sm:$0xff] %v2265_v35 }
 0x16b   : > { %v2232_v19 = vpop.f32.mrf.mxu0  ;;  %v2271_v38 = vpop.f32.mrf.mxu1 }
 0x16c   : > { %2992 = vst [vmem:[#allocation48_spill] sm:$0xff] %v2271_v38 }
 0x16d   : > { %v2236_v21 = vpop.f32.mrf.mxu0  ;;  %v2277_v41 = vpop.f32.mrf.mxu1 }
 0x16e   : > { %2995 = vst [vmem:[#allocation51_spill] sm:$0xff] %v2277_v41 }
 0x16f   : > { %v2238_v22 = vpop.f32.mrf.mxu0  ;;  %v2283_v44 = vpop.f32.mrf.mxu1 }
 0x170   : > { %2998 = vst [vmem:[#allocation54_spill] sm:$0xff] %v2283_v44 }
 0x171   : > { %v2242_v24 = vpop.f32.mrf.mxu0  ;;  %v2289_v27 = vpop.f32.mrf.mxu1 }
 0x172   : > { %3001 = vst [vmem:[#allocation57_spill] sm:$0xff] %v2289_v27 }
 0x173   : > { %v2244_v25 = vpop.f32.mrf.mxu0 }
 0x175   : > { %v2248_v28 = vpop.f32.mrf.mxu0 }
 0x176   : > { %2981 = vst [vmem:[#allocation39_spill] sm:$0xff] %v2248_v28 }
 0x177   : > { %v2257_v31 = vpop.f32.mrf.mxu0 }
 0x178   : > { %2985 = vst [vmem:[#allocation41_spill] sm:$0xff] %v2257_v31 }
 0x179   : > { %v2261_v33 = vpop.f32.mrf.mxu0 }
 0x17a   : > { %2987 = vst [vmem:[#allocation43_spill] sm:$0xff] %v2261_v33 }
 0x17b   : > { %v2263_v34 = vpop.f32.mrf.mxu0 }
 0x17c   : > { %2988 = vst [vmem:[#allocation44_spill] sm:$0xff] %v2263_v34 }
 0x17d   : > { %v2267_v36 = vpop.f32.mrf.mxu0 }
 0x17e   : > { %2990 = vst [vmem:[#allocation46_spill] sm:$0xff] %v2267_v36 }
 0x17f   : > { %v2269_v37 = vpop.f32.mrf.mxu0 }
 0x180   : > { %2991 = vst [vmem:[#allocation47_spill] sm:$0xff] %v2269_v37 }
 0x181   : > { %v2273_v39 = vpop.f32.mrf.mxu0 }
 0x182   : > { %2993 = vst [vmem:[#allocation49_spill] sm:$0xff] %v2273_v39  ;;  %v2295_v39 = vpop.f32.mrf.mxu1 }
 0x183   : > { %v2275_v40 = vpop.f32.mrf.mxu0  ;;  %3004 = vst [vmem:[#allocation60_spill] sm:$0xff] %v2295_v39 }
 0x184   : > { %2994 = vst [vmem:[#allocation50_spill] sm:$0xff] %v2275_v40 }
 0x185   : > { %v2279_v42 = vpop.f32.mrf.mxu0 }
 0x186   : > { %2996 = vst [vmem:[#allocation52_spill] sm:$0xff] %v2279_v42  ;;  %v2301_v42 = vpop.f32.mrf.mxu1 }
 0x187   : > { %v2281_v43 = vpop.f32.mrf.mxu0  ;;  %3007 = vst [vmem:[#allocation63_spill] sm:$0xff] %v2301_v42 }
 0x188   : > { %2997 = vst [vmem:[#allocation53_spill] sm:$0xff] %v2281_v43 }
 0x189   : > { %v2285_v45 = vpop.f32.mrf.mxu0 }
 0x18a   : > { %2999 = vst [vmem:[#allocation55_spill] sm:$0xff] %v2285_v45  ;;  %v2307_v45 = vpop.f32.mrf.mxu1 }
 0x18b   : > { %v2287_v30 = vpop.f32.mrf.mxu0  ;;  %3010 = vst [vmem:[#allocation66_spill] sm:$0xff] %v2307_v45 }
 0x18c   : > { %3000 = vst [vmem:[#allocation56_spill] sm:$0xff] %v2287_v30 }
 0x18d   : > { %v2291_v29 = vpop.f32.mrf.mxu0 }
 0x18e   : > { %3002 = vst [vmem:[#allocation58_spill] sm:$0xff] %v2291_v29  ;;  %v2313_v29 = vpop.f32.mrf.mxu1 }
 0x18f   : > { %v2293_v36 = vpop.f32.mrf.mxu0  ;;  %3013 = vst [vmem:[#allocation69_spill] sm:$0xff] %v2313_v29 }
 0x190   : > { %3003 = vst [vmem:[#allocation59_spill] sm:$0xff] %v2293_v36  ;;  %v2321_v42 = vpop.f32.mrf.mxu1 }
 0x191   : > { %v2297_v40 = vpop.f32.mrf.mxu0  ;;  %3015 = vst [vmem:[#allocation71_spill] sm:$0xff] %v2321_v42 }
 0x192   : > { %3005 = vst [vmem:[#allocation61_spill] sm:$0xff] %v2297_v40  ;;  %v908_v40 = vmax.f32 %v2188_v61, %v2180_v57 }
 0x193   : > { %v2299_v34 = vpop.f32.mrf.mxu0 }
 0x194   : > { %3006 = vst [vmem:[#allocation62_spill] sm:$0xff] %v2299_v34 }
 0x195   : > { %v2303_v43 = vpop.f32.mrf.mxu0 }
 0x196   : > { %3008 = vst [vmem:[#allocation64_spill] sm:$0xff] %v2303_v43  ;;  %v977_v43 = vmax.f32 %v2192_v63, %v2184_v59 }
 0x197   : > { %v2305_v28 = vpop.f32.mrf.mxu0 }
 0x198   : > { %3009 = vst [vmem:[#allocation65_spill] sm:$0xff] %v2305_v28 }
 0x199   : > { %v2309_v30 = vpop.f32.mrf.mxu0 }
 0x19a   : > { %3011 = vst [vmem:[#allocation67_spill] sm:$0xff] %v2309_v30  ;;  %v910_v30 = vmax.f32 %v908_v40, %v2196_v1 }
 0x19b   : > { %v2311_v37 = vpop.f32.mrf.mxu0 }
 0x19c   : > { %3012 = vst [vmem:[#allocation68_spill] sm:$0xff] %v2311_v37  ;;  %v2330_v37 = vpop.f32.mrf.mxu1  ;;  %v912_v61 = vmax.f32 %v910_v30, %v2204_v5 }
 0x19d   : > { %v2315_v36 = vpop.f32.mrf.mxu0  ;;  %3017 = vst [vmem:[#allocation73_spill] sm:$0xff] %v2330_v37 }
 0x19e   : > { %3014 = vst [vmem:[#allocation70_spill] sm:$0xff] %v2315_v36  ;;  %v979_v36 = vmax.f32 %v977_v43, %v2200_v3  ;;  %v2338_v42 = vpop.f32.mrf.mxu1  ;;  %v914_v40 = vmax.f32 %v912_v61, %v2216_v11  ;;  %v868_v61 = vmax.f32 %v2158_v46, %v2166_v50 }
 0x19f   : > { %v2319_v34 = vpop.f32.mrf.mxu0  ;;  %3019 = vst [vmem:[#allocation75_spill] sm:$0xff] %v2338_v42 }
 0x1a0   : > { %v981_v63 = vmax.f32 %v979_v36, %v2210_v8  ;;  %v916_v30 = vmax.f32 %v914_v40, %v2228_v17  ;;  %v937_v40 = vmax.f32 %v2160_v47, %v2168_v51  ;;  %v870_v17 = vmax.f32 %v868_v61, %v2174_v54 }
 0x1a1   : > { %v2325_v28 = vpop.f32.mrf.mxu0  ;;  %v938_v61 = vmax.f32 %v2164_v49, %v2172_v53 }
 0x1a2   : > { %v983_v43 = vmax.f32 %v981_v63, %v2222_v14  ;;  %v918_v11 = vmax.f32 %v916_v30, %v2240_v23  ;;  %v872_v30 = vmax.f32 %v870_v17, %v2186_v60 }
 0x1a3   : > { %v2328_v45 = vpop.f32.mrf.mxu0  ;;  %v940_v17 = vmax.f32 %v938_v61, %v2182_v58 }
 0x1a4   : > { %3016 = vst [vmem:[#allocation72_spill] sm:$0xff] %v2328_v45  ;;  %v2346_v45 = vpop.f32.mrf.mxu1  ;;  %v985_v36 = vmax.f32 %v983_v43, %v2234_v20  ;;  %v869_v43 = vmax.f32 %v2162_v48, %v2170_v52  ;;  %v939_v20 = vmax.f32 %v937_v40, %v2176_v55  ;;  %v920_v23 = vmax.f32 %v918_v11, %v2259_v32  ;;  %v3038_v55 = vld [vmem:[#allocation63_spill] sm:$0xff] }
 0x1a5   : > { %v2333_v29 = vpop.f32.mrf.mxu0  ;;  %3020 = vst [vmem:[#allocation76_spill] sm:$0xff] %v2346_v45  ;;  %v874_v47 = vmax.f32 %v872_v30, %v2202_v4  ;;  %v3044_v4 = vld [vmem:[#allocation66_spill] sm:$0xff] }
 0x1a6   : > { %3018 = vst [vmem:[#allocation74_spill] sm:$0xff] %v2333_v29  ;;  %v2354_v29 = vpop.f32.mrf.mxu1  ;;  %v987_v14 = vmax.f32 %v985_v36, %v2246_v26  ;;  %v871_v36 = vmax.f32 %v869_v43, %v2178_v56  ;;  %v941_v26 = vmax.f32 %v939_v20, %v2190_v62  ;;  %v922_v49 = vmax.f32 %v920_v23, %v2271_v38  ;;  %v3048_v62 = vld [vmem:[#allocation65_spill] sm:$0xff] }
 0x1a7   : > { %v2336_v57 = vpop.f32.mrf.mxu0  ;;  %3021 = vst [vmem:[#allocation77_spill] sm:$0xff] %v2354_v29  ;;  %v876_v52 = vmax.f32 %v874_v47, %v2214_v10  ;;  %v942_v20 = vmax.f32 %v940_v17, %v2198_v2 }
 0x1a8   : > { %v2364_v63 = vpop.f32.mrf.mxu1  ;;  %v989_v48 = vmax.f32 %v987_v14, %v2265_v35  ;;  %v873_v11 = vmax.f32 %v871_v36, %v2194_v0  ;;  %v943_v32 = vmax.f32 %v941_v26, %v2206_v6  ;;  %v3037_v0 = vld [vmem:[#allocation53_spill] sm:$0xff] }
 0x1a9   : > { %v2341_v59 = vpop.f32.mrf.mxu0  ;;  %3022 = vst [vmem:[#allocation78_spill] sm:$0xff] %v2364_v63  ;;  %v878_v61 = vmax.f32 %v876_v52, %v2226_v16  ;;  %v944_v47 = vmax.f32 %v942_v20, %v2212_v9  ;;  %v3049_v6 = vld [vmem:[#allocation69_spill] sm:$0xff] }
 0x1aa   : > { %v2379_v50 = vpop.f32.mrf.mxu1  ;;  %v875_v14 = vmax.f32 %v873_v11, %v2208_v7  ;;  %v945_v30 = vmax.f32 %v943_v32, %v2218_v12  ;;  %v991_v36 = vmax.f32 %v989_v48, %v2277_v41  ;;  %v924_v11 = vmax.f32 %v922_v49, %v2283_v44  ;;  %v3032_v44 = vld [vmem:[#allocation47_spill] sm:$0xff] }
 0x1ab   : > { %v2344_v1 = vpop.f32.mrf.mxu0  ;;  %3024 = vst [vmem:[#allocation80_spill] sm:$0xff] %v2379_v50  ;;  %v880_v17 = vmax.f32 %v878_v61, %v2238_v22  ;;  %v946_v52 = vmax.f32 %v944_v47, %v2224_v15  ;;  %v3043_v7 = vld [vmem:[#allocation59_spill] sm:$0xff] }
 0x1ac   : > { %v2396_v43 = vpop.f32.mrf.mxu1  ;;  %v877_v23 = vmax.f32 %v875_v14, %v2220_v13  ;;  %v947_v38 = vmax.f32 %v945_v30, %v2230_v18  ;;  %v993_v20 = vmax.f32 %v991_v36, %v2289_v27  ;;  %v3036_v27 = vld [vmem:[#allocation49_spill] sm:$0xff] }
 0x1ad   : > { %v2349_v3 = vpop.f32.mrf.mxu0  ;;  %3027 = vst [vmem:[#allocation83_spill] sm:$0xff] %v2396_v43  ;;  %v882_v41 = vmax.f32 %v880_v17, %v2257_v31  ;;  %v948_v30 = vmax.f32 %v946_v52, %v2236_v21  ;;  %v3035_v31 = vld [vmem:[#allocation44_spill] sm:$0xff] }
 0x1ae   : > { %v2405_v26 = vpop.f32.mrf.mxu1  ;;  %v879_v48 = vmax.f32 %v877_v23, %v2232_v19  ;;  %v949_v32 = vmax.f32 %v947_v38, %v2242_v24  ;;  %v909_v23 = vmax.f32 %v2295_v39, %v924_v11  ;;  %v3034_v38 = vld [vmem:[#allocation39_spill] sm:$0xff]  ;;  %v978_v52 = vmax.f32 %v3038_v55, %v993_v20  ;;  %v3047_v55 = vld [vmem:[#allocation61_spill] sm:$0xff] }
 0x1af   : > { %v2352_v5 = vpop.f32.mrf.mxu0  ;;  %3029 = vst [vmem:[#allocation85_spill] sm:$0xff] %v2405_v26  ;;  %v884_v47 = vmax.f32 %v882_v41, %v3032_v44  ;;  %v950_v17 = vmax.f32 %v948_v30, %v3034_v38  ;;  %v3041_v44 = vld [vmem:[#allocation50_spill] sm:$0xff]  ;;  %v3042_v39 = vld [vmem:[#allocation55_spill] sm:$0xff] }
 0x1b0   : > { %v2421_v14 = vpop.f32.mrf.mxu1  ;;  %v881_v49 = vmax.f32 %v879_v48, %v2244_v25  ;;  %v951_v61 = vmax.f32 %v949_v32, %v2261_v33  ;;  %v3040_v32 = vld [vmem:[#allocation46_spill] sm:$0xff] }
 0x1b1   : > { %v2357_v8 = vpop.f32.mrf.mxu0  ;;  %3031 = vst [vmem:[#allocation87_spill] sm:$0xff] %v2421_v14  ;;  %v886_v60 = vmax.f32 %v884_v47, %v3037_v0  ;;  %v952_v41 = vmax.f32 %v950_v17, %v3040_v32  ;;  %v3046_v0 = vld [vmem:[#allocation56_spill] sm:$0xff]  ;;  %v980_v17 = vmax.f32 %v978_v52, %v3049_v6 }
 0x1b2   : > { %v883_v36 = vmax.f32 %v881_v49, %v3035_v31  ;;  %v953_v58 = vmax.f32 %v951_v61, %v3036_v27  ;;  %v2437_v48 = vpop.f32.mrf.mxu1  ;;  %v911_v49 = vmax.f32 %v909_v23, %v3044_v4  ;;  %v3045_v61 = vld [vmem:[#allocation52_spill] sm:$0xff]  ;;  %v3053_v4 = vld [vmem:[#allocation67_spill] sm:$0xff] }
 0x1b3   : > { %v2362_v45 = vpop.f32.mrf.mxu0  ;;  %3039 = vst [vmem:[#allocation39_spill] sm:$0xff] %v2437_v48  ;;  %v888_v30 = vmax.f32 %v886_v60, %v3043_v7  ;;  %v954_v47 = vmax.f32 %v952_v41, %v3045_v61  ;;  %v3054_v61 = vld [vmem:[#allocation71_spill] sm:$0xff] }
 0x1b4   : > { %v885_v11 = vmax.f32 %v883_v36, %v3041_v44  ;;  %v955_v33 = vmax.f32 %v953_v58, %v3042_v39  ;;  %v2453_v36 = vpop.f32.mrf.mxu1  ;;  %v3051_v58 = vld [vmem:[#allocation58_spill] sm:$0xff]  ;;  %v3056_v39 = vld [vmem:[#allocation68_spill] sm:$0xff] }
 0x1b5   : > { %v2370_v29 = vpop.f32.mrf.mxu0  ;;  %v890_v9 = vmax.f32 %v888_v30, %v3048_v62  ;;  %3050 = vst [vmem:[#allocation89_spill] sm:$0xff] %v2453_v36  ;;  %v956_v60 = vmax.f32 %v954_v47, %v3051_v58  ;;  %v3052_v44 = vld [vmem:[#allocation62_spill] sm:$0xff]  ;;  %v982_v47 = vmax.f32 %v980_v17, %v2330_v37 }
 0x1b6   : > { %v887_v20 = vmax.f32 %v885_v11, %v3046_v0  ;;  %v957_v27 = vmax.f32 %v955_v33, %v3047_v55  ;;  %v913_v11 = vmax.f32 %v911_v49, %v3054_v61  ;;  %v3055_v33 = vld [vmem:[#allocation64_spill] sm:$0xff] }
 0x1b7   : > { %v2377_v46 = vpop.f32.mrf.mxu0  ;;  %v892_v41 = vmax.f32 %v890_v9, %v2319_v34  ;;  %v958_v30 = vmax.f32 %v956_v60, %v3055_v33  ;;  %v3061_v55 = vld [vmem:[#allocation76_spill] sm:$0xff] }
 0x1b8   : > { %3023 = vst [vmem:[#allocation79_spill] sm:$0xff] %v2377_v46  ;;  %v889_v23 = vmax.f32 %v887_v20, %v3052_v44  ;;  %v959_v7 = vmax.f32 %v957_v27, %v3053_v4  ;;  %v2469_v20 = vpop.f32.mrf.mxu1  ;;  %v3058_v27 = vld [vmem:[#allocation70_spill] sm:$0xff]  ;;  %v3059_v44 = vld [vmem:[#allocation72_spill] sm:$0xff] }
 0x1b9   : > { %v2387_v40 = vpop.f32.mrf.mxu0  ;;  %v894_v62 = vmax.f32 %v892_v41, %v2336_v57  ;;  %3057 = vst [vmem:[#allocation67_spill] sm:$0xff] %v2469_v20  ;;  %v960_v9 = vmax.f32 %v958_v30, %v3058_v27  ;;  %v984_v30 = vmax.f32 %v982_v47, %v3061_v55 }
 0x1ba   : > { %3025 = vst [vmem:[#allocation81_spill] sm:$0xff] %v2387_v40  ;;  %v891_v52 = vmax.f32 %v889_v23, %v3056_v39  ;;  %v961_v6 = vmax.f32 %v959_v7, %v2325_v28  ;;  %v915_v23 = vmax.f32 %v913_v11, %v2338_v42  ;;  %v3060_v7 = vld [vmem:[#allocation74_spill] sm:$0xff]  ;;  %v3063_v42 = vld [vmem:[#allocation77_spill] sm:$0xff] }
 0x1bb   : > { %v2394_v53 = vpop.f32.mrf.mxu0  ;;  %v896_v60 = vmax.f32 %v894_v62, %v2352_v5  ;;  %v962_v41 = vmax.f32 %v960_v9, %v3060_v7 }
 0x1bc   : > { %3026 = vst [vmem:[#allocation82_spill] sm:$0xff] %v2394_v53  ;;  %v893_v49 = vmax.f32 %v891_v52, %v3059_v44  ;;  %v963_v61 = vmax.f32 %v961_v6, %v2341_v59  ;;  %v2485_v52 = vpop.f32.mrf.mxu1 }
 0x1bd   : > { %v2403_v35 = vpop.f32.mrf.mxu0  ;;  %v898_v39 = vmax.f32 %v896_v60, %v2377_v46  ;;  %3062 = vst [vmem:[#allocation74_spill] sm:$0xff] %v2485_v52  ;;  %v964_v62 = vmax.f32 %v962_v41, %v2349_v3  ;;  %v986_v41 = vmax.f32 %v984_v30, %v2364_v63 }
 0x1be   : > { %3028 = vst [vmem:[#allocation84_spill] sm:$0xff] %v2403_v35  ;;  %v895_v17 = vmax.f32 %v893_v49, %v2344_v1  ;;  %v965_v37 = vmax.f32 %v963_v61, %v2357_v8  ;;  %v917_v49 = vmax.f32 %v915_v23, %v3063_v42 }
 0x1bf   : > { %v2412_v56 = vpop.f32.mrf.mxu0  ;;  %v966_v61 = vmax.f32 %v964_v62, %v2370_v29 }
 0x1c0   : > { %3030 = vst [vmem:[#allocation86_spill] sm:$0xff] %v2412_v56  ;;  %v897_v6 = vmax.f32 %v895_v17, %v2362_v45  ;;  %v967_v11 = vmax.f32 %v965_v37, %v2387_v40  ;;  %v900_v9 = vmax.f32 %v898_v39, %v2412_v56  ;;  %v2501_v17 = vpop.f32.mrf.mxu1 }
 0x1c1   : > { %v2419_v54 = vpop.f32.mrf.mxu0  ;;  %3064 = vst [vmem:[#allocation90_spill] sm:$0xff] %v2501_v17  ;;  %v968_v37 = vmax.f32 %v966_v61, %v2403_v35  ;;  %v988_v61 = vmax.f32 %v986_v41, %v2396_v43 }
 0x1c2   : > { %v899_v47 = vmax.f32 %v897_v6, %v2394_v53  ;;  %v969_v60 = vmax.f32 %v967_v11, %v2419_v54  ;;  %v919_v6 = vmax.f32 %v917_v49, %v2379_v50 }
 0x1c3   : > { %v2428_v51 = vpop.f32.mrf.mxu0 }
 0x1c4   : > { %3033 = vst [vmem:[#allocation88_spill] sm:$0xff] %v2428_v51  ;;  %v901_v39 = vmax.f32 %v899_v47, %v2428_v51  ;;  %v2517_v47 = vpop.f32.mrf.mxu1 }
 0x1c5   : > { %v2435_v2 = vpop.f32.mrf.mxu0  ;;  %3065 = vst [vmem:[#allocation91_spill] sm:$0xff] %v2517_v47 }
 0x1c6   : > { %v970_v11 = vmax.f32 %v968_v37, %v2435_v2  ;;  %v2524_v41 = vpop.f32.mrf.mxu1 }
 0x1c7   : > { %v2444_v31 = vpop.f32.mrf.mxu0 }
 0x1c8   : > { %v902_v55 = vmax.f32 %v900_v9, %v2444_v31 }
 0x1c9   : > { %v2451_v32 = vpop.f32.mrf.mxu0 }
 0x1ca   : > { %v971_v23 = vmax.f32 %v969_v60, %v2451_v32 }
 0x1cb   : > { %v2460_v0 = vpop.f32.mrf.mxu0 }
 0x1cc   : > { %v903_v30 = vmax.f32 %v901_v39, %v2460_v0 }
 0x1cd   : > { %v2467_v58 = vpop.f32.mrf.mxu0 }
 0x1cf   : > { %v2476_v33 = vpop.f32.mrf.mxu0 }
 0x1d0   : > { %v904_v62 = vmax.f32 %v902_v55, %v2476_v33  ;;  %v972_v55 = vmax.f32 %v970_v11, %v2467_v58 }
 0x1d1   : > { %v2483_v27 = vpop.f32.mrf.mxu0 }
 0x1d2   : > { %v973_v9 = vmax.f32 %v971_v23, %v2483_v27 }
 0x1d3   : > { %v2492_v44 = vpop.f32.mrf.mxu0 }
 0x1d4   : > { %v905_v49 = vmax.f32 %v903_v30, %v2492_v44 }
 0x1d5   : > { %v2499_v46 = vpop.f32.mrf.mxu0 }
 0x1d6   : > { %v974_v39 = vmax.f32 %v972_v55, %v2499_v46 }
 0x1d7   : > { %v2508_v42 = vpop.f32.mrf.mxu0 }
 0x1d8   : > { %v906_v63 = vmax.f32 %v904_v62, %v2508_v42 }
 0x1d9   : > { %v2515_v53 = vpop.f32.mrf.mxu0 }
 0x1da   : > { %v921_v60 = vmax.f32 %v919_v6, %v906_v63  ;;  %v975_v50 = vmax.f32 %v973_v9, %v2515_v53  ;;  %v2528_v63 = vpop.f32.mrf.mxu1 }
 0x1db   : > { %v752_v37 = vpop.f32.mrf.mxu0 }
 0x1dc   : > { %v923_v23 = vmax.f32 %v921_v60, %v2405_v26  ;;  %v990_v35 = vmax.f32 %v988_v61, %v975_v50  ;;  %v907_v62 = vmax.f32 %v905_v49, %v752_v37  ;;  %v2534_v61 = vpop.f32.mrf.mxu1 }
 0x1dd   : > { %v754_v51 = vpop.f32.mrf.mxu0 }
 0x1de   : > { %v992_v43 = vmax.f32 %v990_v35, %v2421_v14  ;;  %v925_v56 = vmax.f32 %v923_v23, %v907_v62  ;;  %v976_v40 = vmax.f32 %v974_v39, %v754_v51 }
 0x1e0   : > { %v926_v11 = vmax.f32 %v2437_v48, %v925_v56  ;;  %v994_v30 = vmax.f32 %v992_v43, %v976_v40  ;;  %v2540_v40 = vpop.f32.mrf.mxu1 }
 0x1e2   : > { %v995_v6 = vmax.f32 %v2453_v36, %v994_v30  ;;  %v927_v9 = vmax.f32 %v2469_v20, %v926_v11 }
 0x1e4   : > { %v996_v55 = vmax.f32 %v2485_v52, %v995_v6  ;;  %v928_v50 = vmax.f32 %v2501_v17, %v927_v9  ;;  %v2025_v6 = vmov 1966171168  }
 0x1e5   : > { %v1010_v9 = vunpack.c.l.s4 %v2025_v6 }
 0x1e6   : > { %v997_v49 = vmax.f32 %v2517_v47, %v996_v55  ;;  %v929_v35 = vmax.f32 %v2524_v41, %v928_v50 }
 0x1e7   : > { %v1011_v50 = vunpack.c.0.s8 %v1010_v9 }
 0x1e8   : > { %v998_v60 = vmax.f32 %v2528_v63, %v997_v49  ;;  %v930_v56 = vmax.f32 %v2534_v61, %v929_v35  ;;  %v3066_v49 = vlaneseq }
 0x1ea   : > { %v931_v43 = vrot.slane %v930_v56, 4  ;;  %v999_v39 = vmax.f32 %v2540_v40, %v998_v60  ;;  %v1013_v14 = vshrl.u32 %v3066_v49, 7 }
 0x1ec   : > { %v932_v23 = vmax.f32 %v930_v56, %v931_v43  ;;  %v1000_v62 = vrot.slane %v999_v39, 4  ;;  %v1014_v47 = vsub.s32 %v1011_v50, %v1013_v14  ;;  %v2544_v56 = vld [vmem:[#allocation3] sm:$0x3] }
 0x1ee   : > { %v933_v11 = vrot.slane %v932_v23, 2  ;;  %v1001_v30 = vmax.f32 %v999_v39, %v1000_v62  ;;  %v2554_v62 = vsub.s32 0, %v1013_v14 }
 0x1f0   : > { %v934_v48 = vmax.f32 %v932_v23, %v933_v11  ;;  %v1002_v26 = vrot.slane %v1001_v30, 2 }
 0x1f2   : > { %v935_v55 = vrot.slane %v934_v48, 1  ;;  %v1003_v36 = vmax.f32 %v1001_v30, %v1002_v26 }
 0x1f4   : > { %v1004_v35 = vrot.slane %v1003_v36, 1  ;;  %v936_v17 = vmax.f32 %v934_v48, %v935_v55  ;;  %v2556_v48 = vsub.s32 1, %v1013_v14 }
 0x1f6   : > { %v1005_v20 = vmax.f32 %v1003_v36, %v1004_v35  ;;  %v1859_v36 = vld [vmem:[%s2076_s23 + $0x4] ss:$16 sps:$4 sm:$0xff]  }
 0x1f7   : > { %1512 = vmatprep.mubr.bf16.mxu1 %v1859_v36 }
 0x1f8   : > { %v1008_v52 = vcombine.low %v936_v17, %v1005_v20 }
 0x1fa   : > { %v1015_v60 = vrot.slane %v1008_v52, %v1014_v47 }
 0x1fc   : > { %v1022_v43 = vrot.slane %v1015_v60, %v1014_v47 }
 0x1fe   : > { %v2547_v39 = vmax.f32 %v2544_v56, %v1022_v43 }
 0x200   : > { %v1025_v23 = vsub.f32 %v2544_v56, %v2547_v39  ;;  %1598 = vst.msk [vmem:[#allocation3] sm:$0x3] %vm2251_vm2, %v2547_v39  ;;  %v2561_v20 = vrot.slane %v2547_v39, %v2554_v62  ;;  %v2565_v52 = vrot.slane %v2547_v39, %v2556_v48 }
 0x202   : > { %v1119_v17 = vsub.f32 %v2508_v42, %v2561_v20  ;;  %v1120_v47 = vsub.f32 %v2515_v53, %v2565_v52  ;;  %v1121_v11 = vsub.f32 %v752_v37, %v2561_v20  ;;  %v1122_v14 = vsub.f32 %v754_v51, %v2565_v52 }
 0x203   : > { %v1067_v9 = vsub.f32 %v2238_v22, %v2561_v20  ;;  %v1069_v55 = vsub.f32 %v2244_v25, %v2561_v20  ;;  %v1068_v42 = vsub.f32 %v2242_v24, %v2565_v52  ;;  %v1070_v53 = vsub.f32 %v3034_v38, %v2565_v52 }
 0x204   : > { %v2573_v30 = vpack.c.bf16 %v1121_v11, %v1119_v17  ;;  %v2575_v6 = vpack.c.bf16 %v1122_v14, %v1120_v47  ;;  %v1064_v37 = vsub.f32 %v2230_v18, %v2565_v52  ;;  %v1066_v51 = vsub.f32 %v2236_v21, %v2565_v52  ;;  %v3071_v14 = vld [vmem:[#allocation27_spill] sm:$0xff] }
 0x205   : > { %v1181_v50 = vpack.c.bf16 %v1069_v55, %v1067_v9  ;;  %v1182_v49 = vpack.c.bf16 %v1070_v53, %v1068_v42  ;;  %v1063_v22 = vsub.f32 %v2226_v16, %v2561_v20  ;;  %v1065_v25 = vsub.f32 %v2232_v19, %v2561_v20  ;;  %v3068_v16 = vld [vmem:[#allocation29_spill] sm:$0xff]  ;;  %v3069_v19 = vld [vmem:[#allocation32_spill] sm:$0xff]  ;;  %v3072_v9 = vld [vmem:[#allocation30_spill] sm:$0xff] }
 0x206   : > { %v1060_v24 = vsub.f32 %v2218_v12, %v2565_v52  ;;  %v1062_v38 = vsub.f32 %v2224_v15, %v2565_v52  ;;  %v1180_v35 = vpack.c.bf16 %v1066_v51, %v1064_v37  ;;  %v1059_v21 = vsub.f32 %v2214_v10, %v2561_v20  ;;  %v3070_v15 = vld [vmem:[#allocation21_spill] sm:$0xff] }
 0x207   : > { %v1274_v60 = vmul.bf16 1069105081, %v1181_v50  ;;  %v1277_v18 = vmul.bf16 1069105081, %v1182_v49  ;;  %v1061_v43 = vsub.f32 %v2220_v13, %v2561_v20  ;;  %v1179_v26 = vpack.c.bf16 %v1065_v25, %v1063_v22  ;;  %v3073_v53 = vld [vmem:[#allocation25_spill] sm:$0xff]  ;;  %v3074_v49 = vld [vmem:[#allocation14_spill] sm:$0xff] }
 0x208   : > { %v1056_v36 = vsub.f32 %v3068_v16, %v2565_v52  ;;  %v1058_v17 = vsub.f32 %v3069_v19, %v2565_v52  ;;  %v1178_v12 = vpack.c.bf16 %v1062_v38, %v1060_v24  ;;  %v1271_v47 = vmul.bf16 1069105081, %v1180_v35  ;;  %v3075_v25 = vld [vmem:[#allocation19_spill] sm:$0xff] }
 0x209   : > { %1867 = vpow.bf16 %v1274_v60  ;;  %v1052_v11 = vsub.f32 %v3070_v15, %v2565_v52  ;;  %v1055_v10 = vsub.f32 %v3071_v14, %v2561_v20  ;;  %v1057_v13 = vsub.f32 %v3072_v9, %v2561_v20  ;;  %v3076_v38 = vld [vmem:[#allocation23_spill] sm:$0xff] }
 0x20a   : > { %1869 = vpow.bf16 %v1277_v18  ;;  %v1177_v55 = vpack.c.bf16 %v1061_v43, %v1059_v21  ;;  %v1268_v42 = vmul.bf16 1069105081, %v1179_v26  ;;  %v1054_v37 = vsub.f32 %v3073_v53, %v2565_v52  ;;  %v3077_v21 = vld [vmem:[#allocation17_spill] sm:$0xff] }
 0x20b   : > { %v1176_v51 = vpack.c.bf16 %v1058_v17, %v1056_v36  ;;  %v1265_v50 = vmul.bf16 1069105081, %v1178_v12  ;;  %1871 = vpow.bf16 %v1271_v47  ;;  %v1048_v22 = vsub.f32 %v3074_v49, %v2565_v52  ;;  %v3078_v36 = vld [vmem:[#allocation10_spill] sm:$0xff]  ;;  %v3079_v17 = vld [vmem:[#allocation13_spill] sm:$0xff]  ;;  %v3080_v47 = vld [vmem:[#allocation15_spill] sm:$0xff] }
 0x20c   : > { %v1051_v24 = vsub.f32 %v3075_v25, %v2561_v20  ;;  %v1053_v35 = vsub.f32 %v3076_v38, %v2561_v20  ;;  %v1175_v60 = vpack.c.bf16 %v1057_v13, %v1055_v10  ;;  %v1262_v18 = vmul.bf16 1069105081, %v1177_v55  ;;  %v3081_v10 = vld [vmem:[#allocation12_spill] sm:$0xff]  ;;  %v3084_v49 = vld [vmem:[#allocation11_spill] sm:$0xff] }
 0x20d   : > { %1873 = vpow.bf16 %v1268_v42  ;;  %v1050_v43 = vsub.f32 %v3077_v21, %v2565_v52  ;;  %v1174_v26 = vpack.c.bf16 %v1054_v37, %v1052_v11  ;;  %v1259_v16 = vmul.bf16 1069105081, %v1176_v51  ;;  %v3082_v11 = vld [vmem:[#allocation6_spill] sm:$0xff]  ;;  %v3083_v37 = vld [vmem:[#allocation9_spill] sm:$0xff] }
 0x20e   : > { %1875 = vpow.bf16 %v1265_v50  ;;  %v1044_v19 = vsub.f32 %v3078_v36, %v2565_v52  ;;  %v1047_v12 = vsub.f32 %v3079_v17, %v2561_v20  ;;  %v1049_v15 = vsub.f32 %v3080_v47, %v2561_v20  ;;  %v3087_v36 = vld [vmem:[#allocation7_spill] sm:$0xff] }
 0x20f   : > { %v1173_v14 = vpack.c.bf16 %v1053_v35, %v1051_v24  ;;  %v1256_v9 = vmul.bf16 1069105081, %v1175_v60  ;;  %1877 = vpow.bf16 %v1262_v18  ;;  %v1046_v13 = vsub.f32 %v3081_v10, %v2565_v52  ;;  %v3085_v60 = vld [vmem:[#allocation8_spill] sm:$0xff] }
 0x210   : > { %v1172_v55 = vpack.c.bf16 %v1050_v43, %v1048_v22  ;;  %v1253_v42 = vmul.bf16 1069105081, %v1174_v26  ;;  %1879 = vpow.bf16 %v1259_v16  ;;  %v1040_v53 = vsub.f32 %v3082_v11, %v2565_v52  ;;  %v3086_v26 = vld [vmem:[#allocation5_spill] sm:$0xff] }
 0x211   : > { %v1043_v51 = vsub.f32 %v3083_v37, %v2561_v20  ;;  %v1045_v25 = vsub.f32 %v3084_v49, %v2561_v20  ;;  %v1171_v38 = vpack.c.bf16 %v1049_v15, %v1047_v12  ;;  %v1250_v24 = vmul.bf16 1069105081, %v1173_v14 }
 0x212   : > { %1881 = vpow.bf16 %v1256_v9  ;;  %v1042_v18 = vsub.f32 %v3085_v60, %v2565_v52  ;;  %v1170_v22 = vpack.c.bf16 %v1046_v13, %v1044_v19  ;;  %v1247_v21 = vmul.bf16 1069105081, %v1172_v55 }
 0x213   : > { %1883 = vpow.bf16 %v1253_v42  ;;  %v1039_v16 = vsub.f32 %v3086_v26, %v2561_v20  ;;  %v1041_v17 = vsub.f32 %v3087_v36, %v2561_v20  ;;  %v1100_v12 = vsub.f32 %v2357_v8, %v2565_v52 }
 0x214   : > { %v1169_v47 = vpack.c.bf16 %v1045_v25, %v1043_v51  ;;  %v1244_v15 = vmul.bf16 1069105081, %v1171_v38  ;;  %1885 = vpow.bf16 %v1250_v24  ;;  %v1102_v19 = vsub.f32 %v2370_v29, %v2565_v52 }
 0x215   : > { %v1168_v14 = vpack.c.bf16 %v1042_v18, %v1040_v53  ;;  %v1241_v9 = vmul.bf16 1069105081, %v1170_v22  ;;  %1887 = vpow.bf16 %v1247_v21  ;;  %v1096_v55 = vsub.f32 %v2341_v59, %v2565_v52 }
 0x216   : > { %v1099_v42 = vsub.f32 %v2352_v5, %v2561_v20  ;;  %v1101_v8 = vsub.f32 %v2362_v45, %v2561_v20  ;;  %v1167_v11 = vpack.c.bf16 %v1041_v17, %v1039_v16  ;;  %v1238_v37 = vmul.bf16 1069105081, %v1169_v47 }
 0x217   : > { %v1868_v50 = vpop.eup %1867  ;;  %1889 = vpow.bf16 %v1244_v15  ;;  %v1098_v29 = vsub.f32 %v2349_v3, %v2565_v52  ;;  %v1198_v53 = vpack.c.bf16 %v1102_v19, %v1100_v12  ;;  %v1235_v51 = vmul.bf16 1069105081, %v1168_v14  ;;  %v3092_v19 = vld [vmem:[#allocation68_spill] sm:$0xff] }
 0x218   : > { %v1870_v35 = vpop.eup %1869  ;;  %1891 = vpow.bf16 %v1241_v9  ;;  %v1092_v59 = vsub.f32 %v2325_v28, %v2565_v52  ;;  %v1095_v5 = vsub.f32 %v2336_v57, %v2561_v20  ;;  %v1097_v45 = vsub.f32 %v2344_v1, %v2561_v20  ;;  %v3088_v1 = vld [vmem:[#allocation72_spill] sm:$0xff] }
 0x219   : > { %1480 = vmatprep.subr.bf16.mxu1 %v1870_v35  ;;  %v1872_v43 = vpop.eup %1871  ;;  %v1197_v25 = vpack.c.bf16 %v1101_v8, %v1099_v42  ;;  %v1232_v38 = vmul.bf16 1069105081, %v1167_v11  ;;  %1893 = vpow.bf16 %v1238_v37  ;;  %v1094_v3 = vsub.f32 %v3060_v7, %v2565_v52  ;;  %v3089_v7 = vld [vmem:[#allocation70_spill] sm:$0xff] }
 0x21a   : > { %1481 = vmatpush1.bf16.msra.mxu1 %v1868_v50  ;;  %v1196_v24 = vpack.c.bf16 %v1098_v29, %v1096_v55  ;;  %1895 = vpow.bf16 %v1235_v51  ;;  %v1325_v35 = vmul.bf16 1069105081, %v1198_v53  ;;  %v1088_v28 = vsub.f32 %v3053_v4, %v2565_v52  ;;  %v3090_v4 = vld [vmem:[#allocation61_spill] sm:$0xff]  ;;  %v3094_v29 = vld [vmem:[#allocation55_spill] sm:$0xff] }
 0x21b   : > { %1482 = vmatprep.subr.bf16.mxu1 %v1872_v43  ;;  %v1874_v10 = vpop.eup %1873  ;;  %v1091_v57 = vsub.f32 %v2319_v34, %v2561_v20  ;;  %v1093_v22 = vsub.f32 %v3088_v1, %v2561_v20  ;;  %v1195_v21 = vpack.c.bf16 %v1097_v45, %v1095_v5  ;;  %1897 = vpow.bf16 %v1232_v38  ;;  %v3091_v34 = vld [vmem:[#allocation65_spill] sm:$0xff]  ;;  %v3095_v51 = vld [vmem:[#allocation59_spill] sm:$0xff] }
 0x21c   : > { %v1876_v13 = vpop.eup %1875  ;;  %v1322_v43 = vmul.bf16 1069105081, %v1197_v25  ;;  %v1090_v26 = vsub.f32 %v3089_v7, %v2565_v52  ;;  %v1194_v16 = vpack.c.bf16 %v1094_v3, %v1092_v59  ;;  %v1319_v36 = vmul.bf16 1069105081, %v1196_v24  ;;  %v3097_v25 = vld [vmem:[#allocation58_spill] sm:$0xff] }
 0x21d   : > { %v1878_v50 = vpop.eup %1877  ;;  %1899 = vpow.bf16 %v1325_v35  ;;  %v1084_v47 = vsub.f32 %v3090_v4, %v2565_v52  ;;  %v1087_v15 = vsub.f32 %v3091_v34, %v2561_v20  ;;  %v1089_v14 = vsub.f32 %v3092_v19, %v2561_v20 }
 0x21e   : > { %1483 = vmatpush1.bf16.msra.mxu1 %v1874_v10  ;;  %v1880_v49 = vpop.eup %1879  ;;  %v1193_v9 = vpack.c.bf16 %v1093_v22, %v1091_v57  ;;  %v1316_v10 = vmul.bf16 1069105081, %v1195_v21  ;;  %1901 = vpow.bf16 %v1322_v43  ;;  %v1192_v42 = vpack.c.bf16 %v1090_v26, %v1088_v28  ;;  %v3099_v57 = vld [vmem:[#allocation53_spill] sm:$0xff]  ;;  %v3100_v22 = vld [vmem:[#allocation56_spill] sm:$0xff] }
 0x21f   : > { %1484 = vmatprep.subr.bf16.mxu1 %v1876_v13  ;;  %v3093_v13 = vld [vmem:[#allocation64_spill] sm:$0xff]  ;;  %v1313_v8 = vmul.bf16 1069105081, %v1194_v16  ;;  %1903 = vpow.bf16 %v1319_v36  ;;  %v1080_v53 = vsub.f32 %v3094_v29, %v2565_v52  ;;  %v1191_v5 = vpack.c.bf16 %v1089_v14, %v1087_v15  ;;  %v3103_v15 = vld [vmem:[#allocation47_spill] sm:$0xff]  ;;  %v3104_v14 = vld [vmem:[#allocation50_spill] sm:$0xff] }
 0x220   : > { %v1882_v60 = vpop.eup %1881  ;;  %v1086_v55 = vsub.f32 %v3093_v13, %v2565_v52  ;;  %v1310_v45 = vmul.bf16 1069105081, %v1193_v9  ;;  %1905 = vpow.bf16 %v1316_v10  ;;  %v1082_v38 = vsub.f32 %v3097_v25, %v2565_v52  ;;  %v3101_v26 = vld [vmem:[#allocation52_spill] sm:$0xff] }
 0x221   : > { %v1884_v18 = vpop.eup %1883  ;;  %v1307_v24 = vmul.bf16 1069105081, %v1192_v42  ;;  %1907 = vpow.bf16 %v1313_v8  ;;  %v1079_v1 = vsub.f32 %v3099_v57, %v2561_v20  ;;  %v1081_v21 = vsub.f32 %v3100_v22, %v2561_v20 }
 0x222   : > { %1485 = vmatpush1.bf16.msra.mxu1 %v1878_v50  ;;  %v1886_v17 = vpop.eup %1885  ;;  %v1083_v50 = vsub.f32 %v3095_v51, %v2561_v20  ;;  %v1190_v3 = vpack.c.bf16 %v1086_v55, %v1084_v47  ;;  %v1304_v7 = vmul.bf16 1069105081, %v1191_v5  ;;  %1909 = vpow.bf16 %v1310_v45  ;;  %v3102_v47 = vld [vmem:[#allocation43_spill] sm:$0xff]  ;;  %v3105_v55 = vld [vmem:[#allocation46_spill] sm:$0xff] }
 0x223   : > { %1486 = vmatprep.subr.bf16.mxu1 %v1880_v49  ;;  %v1888_v12 = vpop.eup %1887  ;;  %v3096_v49 = vld [vmem:[#allocation62_spill] sm:$0xff]  ;;  %v1078_v16 = vsub.f32 %v3101_v26, %v2565_v52  ;;  %v1188_v36 = vpack.c.bf16 %v1082_v38, %v1080_v53  ;;  %1911 = vpow.bf16 %v1307_v24  ;;  %v1072_v34 = vsub.f32 %v3102_v47, %v2565_v52  ;;  %v3106_v53 = vld [vmem:[#allocation41_spill] sm:$0xff]  ;;  %v3109_v38 = vld [vmem:[#allocation36_spill] sm:$0xff] }
 0x224   : > { %v1085_v59 = vsub.f32 %v3096_v49, %v2561_v20  ;;  %v1075_v19 = vsub.f32 %v3103_v15, %v2561_v20  ;;  %v1077_v9 = vsub.f32 %v3104_v14, %v2561_v20  ;;  %v1187_v10 = vpack.c.bf16 %v1081_v21, %v1079_v1  ;;  %v3111_v1 = vld [vmem:[#allocation33_spill] sm:$0xff]  ;;  %v3112_v21 = vld [vmem:[#allocation35_spill] sm:$0xff] }
 0x225   : > { %v1890_v11 = vpop.eup %1889  ;;  %1913 = vpow.bf16 %v1304_v7  ;;  %v1074_v42 = vsub.f32 %v3105_v55, %v2565_v52  ;;  %v1071_v51 = vsub.f32 %v3106_v53, %v2561_v20  ;;  %v1131_v22 = vsub.f32 %v3111_v1, %v2561_v20 }
 0x226   : > { %1487 = vmatpush1.bf16.msra.mxu1 %v1882_v60  ;;  %v1892_v37 = vpop.eup %1891  ;;  %v1189_v43 = vpack.c.bf16 %v1085_v59, %v1083_v50  ;;  %v3107_v50 = vld [vmem:[#allocation44_spill] sm:$0xff]  ;;  %v3108_v59 = vld [vmem:[#allocation34_spill] sm:$0xff]  ;;  %v1185_v45 = vpack.c.bf16 %v1077_v9, %v1075_v19  ;;  %v1292_v25 = vmul.bf16 1069105081, %v1187_v10 }
 0x227   : > { %1488 = vmatprep.subr.bf16.mxu1 %v1884_v18  ;;  %v1894_v35 = vpop.eup %1893  ;;  %v3098_v18 = vld [vmem:[#allocation49_spill] sm:$0xff]  ;;  %v1073_v49 = vsub.f32 %v3107_v50, %v2561_v20  ;;  %v1132_v5 = vsub.f32 %v3108_v59, %v2565_v52  ;;  %v1184_v24 = vpack.c.bf16 %v1074_v42, %v1072_v34  ;;  %v3114_v34 = vld [vmem:[#allocation18_spill] sm:$0xff]  ;;  %v3115_v19 = vld [vmem:[#allocation24_spill] sm:$0xff] }
 0x228   : > { %v1896_v60 = vpop.eup %1895  ;;  %v1076_v28 = vsub.f32 %v3098_v18, %v2565_v52  ;;  %v1298_v13 = vmul.bf16 1069105081, %v1189_v43  ;;  %v1133_v43 = vsub.f32 %v3112_v21, %v2561_v20  ;;  %v1286_v26 = vmul.bf16 1069105081, %v1185_v45  ;;  %v3116_v9 = vld [vmem:[#allocation28_spill] sm:$0xff]  ;;  %v3117_v42 = vld [vmem:[#allocation22_spill] sm:$0xff] }
 0x229   : > { %v1183_v7 = vpack.c.bf16 %v1073_v49, %v1071_v51  ;;  %v1124_v15 = vsub.f32 %v3114_v34, %v2565_v52  ;;  %v1127_v14 = vsub.f32 %v3115_v19, %v2561_v20  ;;  %v1129_v10 = vsub.f32 %v3116_v9, %v2561_v20  ;;  %v3118_v51 = vld [vmem:[#allocation16_spill] sm:$0xff] }
 0x22a   : > { %1489 = vmatpush1.bf16.msra.mxu1 %v1886_v17  ;;  %v1301_v17 = vmul.bf16 1069105081, %v1190_v3  ;;  %v1186_v8 = vpack.c.bf16 %v1078_v16, %v1076_v28  ;;  %v1134_v3 = vsub.f32 %v3109_v38, %v2565_v52  ;;  %v3110_v28 = vld [vmem:[#allocation26_spill] sm:$0xff]  ;;  %v3113_v16 = vld [vmem:[#allocation31_spill] sm:$0xff]  ;;  %v1123_v50 = vsub.f32 %v3118_v51, %v2561_v20  ;;  %v3119_v49 = vld [vmem:[#allocation20_spill] sm:$0xff] }
 0x22b   : > { %1490 = vmatprep.subr.bf16.mxu1 %v1888_v12  ;;  %v1898_v12 = vpop.eup %1897  ;;  %v1128_v57 = vsub.f32 %v3110_v28, %v2565_v52  ;;  %v1280_v55 = vmul.bf16 1069105081, %v1183_v7  ;;  %v1125_v59 = vsub.f32 %v3119_v49, %v2561_v20  ;;  %v1118_v28 = vsub.f32 %v2499_v46, %v2565_v52  ;;  %v3124_v49 = vld [vmem:[#allocation79_spill] sm:$0xff] }
 0x22c   : > { %v1900_v4 = vpop.eup %1899  ;;  %1915 = vpow.bf16 %v1301_v17  ;;  %v1214_v17 = vpack.c.bf16 %v1134_v3, %v1132_v5  ;;  %v1211_v5 = vpack.c.bf16 %v1129_v10, %v1127_v14  ;;  %v1112_v21 = vsub.f32 %v2451_v32, %v2565_v52  ;;  %v3122_v10 = vld [vmem:[#allocation88_spill] sm:$0xff] }
 0x22d   : > { %1917 = vpow.bf16 %v1298_v13  ;;  %v1213_v13 = vpack.c.bf16 %v1133_v43, %v1131_v22  ;;  %v1115_v43 = vsub.f32 %v2476_v33, %v2561_v20  ;;  %v1117_v7 = vsub.f32 %v2492_v44, %v2561_v20 }
 0x22e   : > { %1491 = vmatpush1.bf16.msra.mxu1 %v1890_v11  ;;  %v1295_v11 = vmul.bf16 1069105081, %v1188_v36  ;;  %v1130_v36 = vsub.f32 %v3113_v16, %v2565_v52  ;;  %v1114_v46 = vsub.f32 %v2467_v58, %v2565_v52  ;;  %v1355_v16 = vmul.bf16 1069105081, %v2575_v6  ;;  %v324_v6 = vld [vmem:[%s2076_s23 + $0x20] sm:$0xff] }
 0x22f   : > { %1492 = vmatprep.subr.bf16.mxu1 %v1892_v37  ;;  %v1902_v37 = vpop.eup %1901  ;;  %v1370_v45 = vmul.bf16 1069105081, %v1213_v13  ;;  %v1108_v33 = vsub.f32 %v2419_v54, %v2565_v52  ;;  %v1111_v44 = vsub.f32 %v2444_v31, %v2561_v20  ;;  %v1352_v58 = vmul.bf16 1069105081, %v2573_v30  ;;  %v3120_v31 = vld [vmem:[#allocation81_spill] sm:$0xff] }
 0x230   : > { %v1904_v29 = vpop.eup %1903  ;;  %1919 = vpow.bf16 %v1295_v11  ;;  %v1212_v11 = vpack.c.bf16 %v1130_v36, %v1128_v57  ;;  %v1104_v14 = vsub.f32 %v3120_v31, %v2565_v52  ;;  %v1811_v30 = vcombine.high %v324_v6, %v324_v6  ;;  %v3133_v31 = vld [vmem:[#allocation39_spill] sm:$0xff] }
 0x231   : > { %1921 = vpow.bf16 %v1292_v25  ;;  %v1109_v13 = vsub.f32 %v3122_v10, %v2561_v20  ;;  %v1164_v51 = vsub.f32 %v2528_v63, %v2565_v52 }
 0x232   : > { %1493 = vmatpush1.bf16.msra.mxu1 %v1894_v35  ;;  %v1289_v35 = vmul.bf16 1069105081, %v1186_v8  ;;  %v1126_v8 = vsub.f32 %v3117_v42, %v2565_v52  ;;  %v1367_v38 = vmul.bf16 1069105081, %v1212_v11 }
 0x233   : > { %1494 = vmatprep.subr.bf16.mxu1 %v1896_v60  ;;  %v1906_v60 = vpop.eup %1905 }
 0x234   : > { %v1908_v18 = vpop.eup %1907  ;;  %1923 = vpow.bf16 %v1289_v35  ;;  %v1210_v25 = vpack.c.bf16 %v1126_v8, %v1124_v15  ;;  %v1209_v35 = vpack.c.bf16 %v1125_v59, %v1123_v50  ;;  %v1857_v15 = vld [vmem:[%s2076_s23] ss:$16 sps:$4 sm:$0xff]   ;;  %v1166_v50 = vsub.f32 %v2540_v40, %v2565_v52 }
 0x235   : > { %1925 = vpow.bf16 %v1286_v26  ;;  %v1103_v59 = vsub.f32 %v3124_v49, %v2561_v20 }
 0x236   : > { %1495 = vmatpush1.bf16.msra.mxu1 %v1898_v12  ;;  %v1283_v12 = vmul.bf16 1069105081, %v1184_v24  ;;  %v1361_v57 = vmul.bf16 1069105081, %v1210_v25  ;;  %v1358_v26 = vmul.bf16 1069105081, %v1209_v35  ;;  %v1810_v35 = vcombine.low %v324_v6, %v324_v6 }
 0x237   : > { %1496 = vmatprep.subr.bf16.mxu1 %v1900_v4  ;;  %v1910_v4 = vpop.eup %1909  ;;  %v1230_v40 = vpack.c.bf16 %v1166_v50, %v1164_v51  ;;  %v3131_v6 = vld [vmem:[#allocation89_spill] sm:$0xff]  ;;  %v3138_v50 = vld [vmem:[#allocation80_spill] sm:$0xff] }
 0x238   : > { %v1912_v47 = vpop.eup %1911  ;;  %1927 = vpow.bf16 %v1283_v12  ;;  %v1205_v12 = vpack.c.bf16 %v1117_v7, %v1115_v43  ;;  %v3127_v7 = vld [vmem:[#allocation91_spill] sm:$0xff]  ;;  %v1153_v49 = vsub.f32 %v3138_v50, %v2561_v20 }
 0x239   : > { %1929 = vpow.bf16 %v1280_v55 }
 0x23a   : > { %1497 = vmatpush2.bf16.msra.mxu1 %v1902_v37  ;;  %v1373_v37 = vmul.bf16 1069105081, %v1214_v17  ;;  %v1113_v17 = vsub.f32 %v2460_v0, %v2561_v20  ;;  %v3121_v0 = vld [vmem:[#allocation86_spill] sm:$0xff]  ;;  %v1346_v42 = vmul.bf16 1069105081, %v1205_v12  ;;  %v3130_v12 = vld [vmem:[#allocation87_spill] sm:$0xff] }
 0x23b   : > { %1498 = vmatprep.subr.bf16.mxu1 %v1904_v29  ;;  %v1914_v29 = vpop.eup %1913  ;;  %v1107_v9 = vsub.f32 %v3121_v0, %v2561_v20 }
 0x23c   : > { %v1916_v53 = vpop.eup %1915  ;;  %1931 = vpow.bf16 %v1373_v37  ;;  %v1203_v55 = vpack.c.bf16 %v1113_v17, %v1111_v44 }
 0x23d   : > { %v1918_v3 = vpop.eup %1917  ;;  %1933 = vpow.bf16 %v1370_v45  ;;  %v1201_v25 = vpack.c.bf16 %v1109_v13, %v1107_v9  ;;  %v3135_v13 = vld [vmem:[#allocation83_spill] sm:$0xff] }
 0x23e   : > { %1499 = vmatpush2.bf16.msra.mxu1 %v1906_v60  ;;  %v1920_v24 = vpop.eup %1919  ;;  %v1364_v60 = vmul.bf16 1069105081, %v1211_v5  ;;  %1935 = vpow.bf16 %v1367_v38  ;;  %v3125_v5 = vld [vmem:[#allocation82_spill] sm:$0xff]  ;;  %v1340_v38 = vmul.bf16 1069105081, %v1203_v55  ;;  %v1154_v55 = vsub.f32 %v3135_v13, %v2565_v52 }
 0x23f   : > { %1500 = vmatprep.subr.bf16.mxu1 %v1908_v18  ;;  %v1116_v18 = vsub.f32 %v2483_v27, %v2565_v52  ;;  %v1922_v1 = vpop.eup %1921  ;;  %v1105_v45 = vsub.f32 %v3125_v5, %v2561_v20 }
 0x240   : > { %1937 = vpow.bf16 %v1364_v60 }
 0x241   : > { %v1206_v27 = vpack.c.bf16 %v1118_v28, %v1116_v18  ;;  %1939 = vpow.bf16 %v1361_v57  ;;  %v1163_v18 = vsub.f32 %v2524_v41, %v2561_v20  ;;  %v1864_v28 = vld [vmem:[%s2076_s23 + $0xc] ss:$16 sps:$4 sm:$0xff]   ;;  %v1165_v57 = vsub.f32 %v2534_v61, %v2561_v20 }
 0x242   : > { %1501 = vmatpush2.bf16.msra.mxu1 %v1910_v4  ;;  %v1924_v22 = vpop.eup %1923  ;;  %1941 = vpow.bf16 %v1358_v26  ;;  %v1110_v4 = vsub.f32 %v2435_v2, %v2565_v52  ;;  %v3123_v2 = vld [vmem:[#allocation84_spill] sm:$0xff]  ;;  %v1162_v26 = vsub.f32 %v3127_v7, %v2565_v52  ;;  %v3129_v61 = vld [vmem:[#allocation90_spill] sm:$0xff] }
 0x243   : > { %1502 = vmatprep.subr.bf16.mxu1 %v1912_v47  ;;  %v1926_v36 = vpop.eup %1925  ;;  %v1204_v47 = vpack.c.bf16 %v1114_v46, %v1112_v21  ;;  %v1349_v34 = vmul.bf16 1069105081, %v1206_v27  ;;  %1943 = vpow.bf16 %v1355_v16  ;;  %v1106_v8 = vsub.f32 %v3123_v2, %v2565_v52  ;;  %v3126_v21 = vld [vmem:[#allocation74_spill] sm:$0xff] }
 0x244   : > { %1945 = vpow.bf16 %v1352_v58  ;;  %v1202_v11 = vpack.c.bf16 %v1110_v4, %v1108_v33  ;;  %v1160_v43 = vsub.f32 %v3126_v21, %v2565_v52  ;;  %v1421_v16 = vmul.bf16 1069105081, %v1230_v40  ;;  %v3141_v40 = vld [vmem:[#allocation71_spill] sm:$0xff]  ;;  %v3143_v21 = vld [vmem:[#allocation69_spill] sm:$0xff] }
 0x245   : > { %v1343_v37 = vmul.bf16 1069105081, %v1204_v47  ;;  %1947 = vpow.bf16 %v1349_v34  ;;  %v1161_v33 = vsub.f32 %v3129_v61, %v2561_v20  ;;  %v1229_v44 = vpack.c.bf16 %v1165_v57, %v1163_v18  ;;  %v3146_v61 = vld [vmem:[#allocation66_spill] sm:$0xff] }
 0x246   : > { %1503 = vmatpush2.bf16.msra.mxu1 %v1914_v29  ;;  %v1928_v32 = vpop.eup %1927  ;;  %1949 = vpow.bf16 %v1346_v42  ;;  %v1156_v58 = vsub.f32 %v3130_v12, %v2565_v52  ;;  %v1158_v4 = vsub.f32 %v3131_v6, %v2565_v52  ;;  %v1228_v47 = vpack.c.bf16 %v1162_v26, %v1160_v43 }
 0x247   : > { %1504 = vmatprep.subr.bf16.mxu1 %v1916_v53  ;;  %v1930_v54 = vpop.eup %1929  ;;  %1951 = vpow.bf16 %v1343_v37  ;;  %v1418_v9 = vmul.bf16 1069105081, %v1229_v44  ;;  %v3136_v37 = vld [vmem:[#allocation73_spill] sm:$0xff]  ;;  %v1147_v18 = vsub.f32 %v3141_v40, %v2561_v20  ;;  %v1146_v43 = vsub.f32 %v3143_v21, %v2565_v52 }
 0x248   : > { %1953 = vpow.bf16 %v1340_v38  ;;  %v1226_v42 = vpack.c.bf16 %v1158_v4, %v1156_v58  ;;  %v1415_v2 = vmul.bf16 1069105081, %v1228_v47  ;;  %v3147_v58 = vld [vmem:[#allocation57_spill] sm:$0xff] }
 0x249   : > { %v1142_v6 = vsub.f32 %v3147_v58, %v2565_v52 }
 0x24a   : > { %1505 = vmatpush2.bf16.msra.mxu1 %v1918_v3  ;;  %v1932_v19 = vpop.eup %1931  ;;  %v1200_v3 = vpack.c.bf16 %v1106_v8, %v1104_v14  ;;  %v1157_v14 = vsub.f32 %v3133_v31, %v2561_v20 }
 0x24b   : > { %1506 = vmatprep.subr.bf16.mxu1 %v1920_v24  ;;  %v1934_v29 = vpop.eup %1933  ;;  %v1337_v24 = vmul.bf16 1069105081, %v1202_v11 }
 0x24c   : > { %v1936_v53 = vpop.eup %1935  ;;  %v1331_v46 = vmul.bf16 1069105081, %v1200_v3  ;;  %v1409_v3 = vmul.bf16 1069105081, %v1226_v42 }
 0x24d   : > { %1955 = vpow.bf16 %v1337_v24 }
 0x24e   : > { %1507 = vmatpush2.bf16.msra.mxu1 %v1922_v1  ;;  %v1938_v63 = vpop.eup %1937  ;;  %v1199_v1 = vpack.c.bf16 %v1105_v45, %v1103_v59  ;;  %v3139_v45 = vld [vmem:[#allocation76_spill] sm:$0xff] }
 0x24f   : > { %1508 = vmatprep.subr.bf16.mxu1 %v1924_v22  ;;  %v1940_v60 = vpop.eup %1939  ;;  %v1334_v22 = vmul.bf16 1069105081, %v1201_v25  ;;  %v1150_v25 = vsub.f32 %v3139_v45, %v2565_v52 }
 0x250   : > { %v1942_v27 = vpop.eup %1941  ;;  %v1328_v17 = vmul.bf16 1069105081, %v1199_v1 }
 0x251   : > { %v1944_v41 = vpop.eup %1943  ;;  %1957 = vpow.bf16 %v1334_v22 }
 0x252   : > { %1509 = vmatpush2.bf16.msra.mxu1 %v1926_v36  ;;  %v3128_v36 = vld [vmem:[#allocation67_spill] sm:$0xff]  ;;  %1959 = vpow.bf16 %v1331_v46  ;;  %v1946_v34 = vpop.eup %1945 }
 0x253   : > { %1510 = vmatprep.subr.bf16.mxu1 %v1928_v32  ;;  %v1159_v32 = vsub.f32 %v3128_v36, %v2561_v20  ;;  %1961 = vpow.bf16 %v1421_v16  ;;  %v3145_v36 = vld [vmem:[#allocation60_spill] sm:$0xff] }
 0x254   : > { %1963 = vpow.bf16 %v1328_v17 }
 0x255   : > { %v1227_v0 = vpack.c.bf16 %v1161_v33, %v1159_v32  ;;  %1965 = vpow.bf16 %v1418_v9  ;;  %v1143_v32 = vsub.f32 %v3145_v36, %v2561_v20  ;;  %v1145_v33 = vsub.f32 %v3146_v61, %v2561_v20 }
 0x256   : > { %1511 = vmatpush2.bf16.msra.mxu1 %v1930_v54  ;;  %v1948_v54 = vpop.eup %1947  ;;  %1967 = vpow.bf16 %v1415_v2 }
 0x257   : > { %1531 = vmatprep.subr.bf16.mxu1 %v1932_v19  ;;  %v1950_v8 = vpop.eup %1949  ;;  %v1412_v5 = vmul.bf16 1069105081, %v1227_v0  ;;  %v1219_v9 = vpack.c.bf16 %v1145_v33, %v1143_v32 }
 0x258   : > { %v1952_v11 = vpop.eup %1951 }
 0x259   : > { %1513 = vmatmul.mubr.bf16.vlgmr.msra.gmra.mxu1 %v1857_v15  ;;  %v3132_v15 = vld [vmem:[#allocation85_spill] sm:$0xff]  ;;  %v1954_v24 = vpop.eup %1953  ;;  %1969 = vpow.bf16 %v1412_v5  ;;  %v1388_v50 = vmul.bf16 1069105081, %v1219_v9 }
 0x25a   : > { %1532 = vmatpush1.bf16.msra.mxu1 %v1934_v29  ;;  %1522 = vmatprep.mubr.bf16.mxu1 %v1811_v30  ;;  %v1155_v19 = vsub.f32 %v3132_v15, %v2561_v20  ;;  %v3134_v30 = vld [vmem:[#allocation78_spill] sm:$0xff]  ;;  %v1148_v29 = vsub.f32 %v3136_v37, %v2565_v52  ;;  %1971 = vpow.bf16 %v1409_v3 }
 0x25b   : > { %1533 = vmatprep.subr.bf16.mxu1 %v1936_v53  ;;  %v1152_v10 = vsub.f32 %v3134_v30, %v2565_v52  ;;  %v3137_v53 = vld [vmem:[#allocation77_spill] sm:$0xff] }
 0x25c   : > { %v1151_v51 = vsub.f32 %v3137_v53, %v2561_v20  ;;  %v1225_v59 = vpack.c.bf16 %v1157_v14, %v1155_v19  ;;  %v1222_v7 = vpack.c.bf16 %v1150_v25, %v1148_v29  ;;  %v3149_v19 = vld [vmem:[#allocation48_spill] sm:$0xff]  ;;  %v3150_v14 = vld [vmem:[#allocation54_spill] sm:$0xff] }
 0x25d   : > { %v1224_v38 = vpack.c.bf16 %v1154_v55, %v1152_v10  ;;  %v1139_v31 = vsub.f32 %v3149_v19, %v2561_v20  ;;  %v1141_v0 = vsub.f32 %v3150_v14, %v2561_v20  ;;  %v3151_v10 = vld [vmem:[#allocation45_spill] sm:$0xff]  ;;  %v3153_v29 = vld [vmem:[#allocation42_spill] sm:$0xff] }
 0x25e   : > { %1534 = vmatpush1.bf16.msra.mxu1 %v1938_v63  ;;  %v1956_v63 = vpop.eup %1955  ;;  %v1223_v1 = vpack.c.bf16 %v1153_v49, %v1151_v51  ;;  %v1406_v22 = vmul.bf16 1069105081, %v1225_v59  ;;  %v1397_v47 = vmul.bf16 1069105081, %v1222_v7  ;;  %v1138_v13 = vsub.f32 %v3151_v10, %v2565_v52 }
 0x25f   : > { %1535 = vmatprep.subr.bf16.mxu1 %v1940_v60  ;;  %v1403_v26 = vmul.bf16 1069105081, %v1224_v38  ;;  %v1958_v46 = vpop.eup %1957  ;;  %v1137_v53 = vsub.f32 %v3153_v29, %v2561_v20  ;;  %v1217_v51 = vpack.c.bf16 %v1141_v0, %v1139_v31 }
 0x260   : > { %v1400_v17 = vmul.bf16 1069105081, %v1223_v1  ;;  %1973 = vpow.bf16 %v1406_v22  ;;  %v325_v22 = vld [vmem:[%s2076_s23 + $0x28] sm:$0xff] }
 0x261   : > { %1523 = vmatmul.mubr.bf16.gmra.mxu1 %v1810_v35  ;;  %v3140_v35 = vld [vmem:[#allocation63_spill] sm:$0xff]  ;;  %1975 = vpow.bf16 %v1403_v26  ;;  %v1382_v25 = vmul.bf16 1069105081, %v1217_v51  ;;  %v1813_v7 = vcombine.high %v325_v22, %v325_v22  ;;  %v1812_v26 = vcombine.low %v325_v22, %v325_v22 }
 0x262   : > { %1536 = vmatpush1.bf16.msra.mxu1 %v1942_v27  ;;  %1563 = vmatprep.mubr.bf16.mxu1 %v1864_v28  ;;  %v1144_v60 = vsub.f32 %v3140_v35, %v2565_v52  ;;  %v3142_v28 = vld [vmem:[#allocation75_spill] sm:$0xff]  ;;  %v1960_v27 = vpop.eup %1959  ;;  %1977 = vpow.bf16 %v1400_v17 }
 0x263   : > { %1537 = vmatprep.subr.bf16.mxu1 %v1944_v41  ;;  %v1149_v57 = vsub.f32 %v3142_v28, %v2561_v20  ;;  %v3144_v41 = vld [vmem:[#allocation51_spill] sm:$0xff]  ;;  %v1962_v12 = vpop.eup %1961  ;;  %1979 = vpow.bf16 %v1397_v47 }
 0x264   : > { %v1140_v16 = vsub.f32 %v3144_v41, %v2565_v52  ;;  %v1220_v4 = vpack.c.bf16 %v1146_v43, %v1144_v60  ;;  %v1862_v43 = vld [vmem:[%s2076_s23 + $0x8] ss:$16 sps:$4 sm:$0xff]  }
 0x265   : > { %v1221_v44 = vpack.c.bf16 %v1149_v57, %v1147_v18 }
 0x266   : > { %1538 = vmatpush1.bf16.msra.mxu1 %v1946_v34  ;;  %v1964_v34 = vpop.eup %1963  ;;  %v1218_v55 = vpack.c.bf16 %v1142_v6, %v1140_v16  ;;  %v1391_v42 = vmul.bf16 1069105081, %v1220_v4 }
 0x267   : > { %1539 = vmatprep.subr.bf16.mxu1 %v1948_v54  ;;  %v3148_v54 = vld [vmem:[#allocation38_spill] sm:$0xff]  ;;  %v1394_v30 = vmul.bf16 1069105081, %v1221_v44  ;;  %v1966_v2 = vpop.eup %1965  ;;  %v1026_v44 = vmul.f32 1.442695, %v1025_v23 }
 0x268   : > { %v1136_v15 = vsub.f32 %v3148_v54, %v2565_v52  ;;  %v1385_v59 = vmul.bf16 1069105081, %v1218_v55 }
 0x269   : > { %1981 = vpow.bf16 %v1394_v30 }
 0x26a   : > { %1540 = vmatpush1.bf16.msra.mxu1 %v1950_v8  ;;  %v1968_v8 = vpop.eup %1967  ;;  %v1216_v49 = vpack.c.bf16 %v1138_v13, %v1136_v15  ;;  %1983 = vpow.bf16 %v1391_v42 }
 0x26b   : > { %1541 = vmatprep.subr.bf16.mxu1 %v1952_v11  ;;  %v3152_v11 = vld [vmem:[#allocation37_spill] sm:$0xff]  ;;  %v1970_v52 = vpop.eup %1969  ;;  %1985 = vpow.bf16 %v1388_v50 }
 0x26c   : > { %v1135_v37 = vsub.f32 %v3152_v11, %v2561_v20  ;;  %v1972_v5 = vpop.eup %1971  ;;  %v1379_v38 = vmul.bf16 1069105081, %v1216_v49  ;;  %1987 = vpow.bf16 %v1385_v59 }
 0x26d   : > { %1989 = vpow.bf16 %v1382_v25 }
 0x26e   : > { %1542 = vmatpush1.bf16.msra.mxu1 %v1954_v24  ;;  %v1215_v45 = vpack.c.bf16 %v1137_v53, %v1135_v37  ;;  %v1974_v3 = vpop.eup %1973  ;;  %1991 = vpow.bf16 %v1379_v38 }
 0x26f   : > { %1543 = vmatprep.subr.bf16.mxu1 %v1956_v63  ;;  %v1976_v24 = vpop.eup %1975 }
 0x270   : > { %v1376_v20 = vmul.bf16 1069105081, %v1215_v45  ;;  %v1978_v63 = vpop.eup %1977 }
 0x271   : > { %v1980_v35 = vpop.eup %1979 }
 0x272   : > { %1544 = vmatpush1.bf16.msra.mxu1 %v1958_v46  ;;  %1993 = vpow.bf16 %v1376_v20 }
 0x273   : > { %1545 = vmatprep.subr.bf16.mxu1 %v1960_v27  ;;  %1995 = vpow2.f32 %v1026_v44 }
 0x276   : > { %1546 = vmatpush1.bf16.msra.mxu1 %v1964_v34 }
 0x277   : > { %1547 = vmatprep.subr.bf16.mxu1 %v1962_v12  ;;  %v1982_v60 = vpop.eup %1981 }
 0x278   : > { %v1984_v40 = vpop.eup %1983 }
 0x279   : > { %v1986_v18 = vpop.eup %1985 }
 0x27a   : > { %1548 = vmatpush2.bf16.msra.mxu1 %v1966_v2  ;;  %v1988_v28 = vpop.eup %1987 }
 0x27b   : > { %1549 = vmatprep.subr.bf16.mxu1 %v1968_v8  ;;  %v1990_v57 = vpop.eup %1989 }
 0x27c   : > { %v1992_v1 = vpop.eup %1991 }
 0x27e   : > { %1550 = vmatpush2.bf16.msra.mxu1 %v1970_v52 }
 0x27f   : > { %1551 = vmatprep.subr.bf16.mxu1 %v1972_v5 }
 0x280   : > { %v1994_v21 = vpop.eup %1993 }
 0x281   : > { %v1996_v17 = vpop.eup %1995 }
 0x282   : > { %1552 = vmatpush2.bf16.msra.mxu1 %v1974_v3  ;;  %v1433_v12 = vrot.slane %v1996_v17, %v2554_v62  ;;  %v1437_v58 = vrot.slane %v1996_v17, %v2556_v48 }
 0x283   : > { %1553 = vmatprep.subr.bf16.mxu1 %v1976_v24 }
 0x284   : > { %v1440_v4 = vmul.f32 0.0, %v1433_v12  ;;  %v1441_v15 = vmul.f32 0.0, %v1437_v58 }
 0x286   : > { %1554 = vmatpush2.bf16.msra.mxu1 %v1978_v63 }
 0x287   : > { %1555 = vmatprep.subr.bf16.mxu1 %v1980_v35 }
 0x28a   : > { %1556 = vmatpush2.bf16.msra.mxu1 %v1982_v60 }
 0x28b   : > { %1557 = vmatprep.subr.bf16.mxu1 %v1984_v40 }
 0x28e   : > { %1558 = vmatpush2.bf16.msra.mxu1 %v1986_v18 }
 0x28f   : > { %1559 = vmatprep.subr.bf16.mxu1 %v1988_v28 }
 0x292   : > { %1560 = vmatpush2.bf16.msra.mxu1 %v1990_v57 }
 0x293   : > { %1561 = vmatprep.subr.bf16.mxu1 %v1992_v1 }
 0x296   : > { %1562 = vmatpush2.bf16.msra.mxu1 %v1994_v21 }
 0x299   : > { %1564 = vmatmul.mubr.bf16.vlgmr.msra.gmra.mxu1 %v1862_v43 }
 0x29a   : > { %1573 = vmatprep.mubr.bf16.mxu1 %v1813_v7 }
 0x2a1   : > { %1574 = vmatmul.mubr.bf16.gmra.mxu1 %v1812_v26 }
 0x319   : > { %v1514_v46 = vpop.f32.mrf.mxu1 }
 0x31b   : > { %v1516_v27 = vpop.f32.mrf.mxu1 }
 0x31d   : > { %v1518_v41 = vpop.f32.mrf.mxu1 }
 0x31f   : > { %v1520_v16 = vpop.f32.mrf.mxu1 }
 0x321   : > { %v1524_v36 = vpop.f32.mrf.mxu1 }
 0x323   : > { %v1526_v32 = vpop.f32.mrf.mxu1 }
 0x325   : > { %v1528_v61 = vpop.f32.mrf.mxu1 }
 0x327   : > { %v1529_v33 = vpop.f32.mrf.mxu1 }
 0x359   : > { %v1565_v6 = vpop.f32.mrf.mxu1 }
 0x35a   : > { %v1566_v47 = vadd.f32 %v1565_v6, %v1514_v46 }
 0x35b   : > { %v1567_v34 = vpop.f32.mrf.mxu1 }
 0x35c   : > { %v1582_v54 = vadd.f32 %v1566_v47, %v1440_v4  ;;  %v1568_v19 = vadd.f32 %v1567_v34, %v1516_v27 }
 0x35d   : > { %v1569_v31 = vpop.f32.mrf.mxu1 }
 0x35e   : > { %v1583_v14 = vadd.f32 %v1568_v19, %v1441_v15  ;;  %v1570_v0 = vadd.f32 %v1569_v31, %v1518_v41 }
 0x35f   : > { %v1571_v9 = vpop.f32.mrf.mxu1 }
 0x360   : > { %v1584_v56 = vadd.f32 %v1570_v0, %v1440_v4  ;;  %v1572_v39 = vadd.f32 %v1571_v9, %v1520_v16 }
 0x361   : > { %v1575_v23 = vpop.f32.mrf.mxu1 }
 0x362   : > { %v1585_v30 = vadd.f32 %v1572_v39, %v1441_v15  ;;  %v1576_v10 = vadd.f32 %v1575_v23, %v1524_v36 }
 0x363   : > { %v1577_v13 = vpop.f32.mrf.mxu1 }
 0x364   : > { %v1586_v55 = vadd.f32 %v1576_v10, %v1440_v4  ;;  %v1578_v42 = vadd.f32 %v1577_v13, %v1526_v32 }
 0x365   : > { %v1579_v2 = vpop.f32.mrf.mxu1 }
 0x366   : > { %1592 = vst [vmem:[#allocation4 + $0x20] sm:$0xff] %v1586_v55  ;;  %v1587_v8 = vadd.f32 %v1578_v42, %v1441_v15 }
 0x367   : > { %v1580_v11 = vpop.f32.mrf.mxu1 }
 0x368   : > { %1593 = vst [vmem:[#allocation4 + $0x28] sm:$0xff] %v1587_v8 }
 0x36f   : > { %v1603_v37 = vld [vmem:[#allocation4 + $0x20] ss:$8 sm:$0x3] }
 0x370   : > { %1997 = vrcp.f32 %v1603_v37 }
 0x37d   : > { %v1998_v29 = vpop.eup %1997 }
 0x37e   : > { %v1613_v53 = vrot.slane %v1998_v29, %v2554_v62  ;;  %v1617_v51 = vrot.slane %v1998_v29, %v2556_v48 }
 0x380   : > { %v1620_v50 = vmul.f32 %v1613_v53, %v1582_v54  ;;  %v1621_v49 = vmul.f32 %v1617_v51, %v1583_v14  ;;  %v1622_v59 = vmul.f32 %v1613_v53, %v1584_v56  ;;  %v1623_v52 = vmul.f32 %v1617_v51, %v1585_v30 }
 0x382   : > { %1624 = vst [vmem:[%s287_s30] sm:$0xff] %v1620_v50  ;;  %1625 = vst [vmem:[%s287_s30 + $0x8] sm:$0xff] %v1621_v49 }
 0x383   : > { %1626 = vst [vmem:[%s287_s30 + $0x10] sm:$0xff] %v1622_v59  ;;  %1627 = vst [vmem:[%s287_s30 + $0x18] sm:$0xff] %v1623_v52 }
 0x384 PF: > { %s13_s14 = sadd.s32 1, %s2021_s14   ;;  %s3154_s12 = smov %s2017_s13 }
 0x385   : > { %p10_p5 = scmp.ge.s32.totalorder %s13_s14, 4   ;;  %s3155_s13 = smov %s3157_s15 }
 0x387   :  { %12 = sbr.rel (!%p10_p5) target bundleno = 2 (0x2), region = 77 }

</bundles_post_ra>
